<compile_context>
chip_gen: v6e
topology: v6e:2x2x1
jax: 0.10.0
libtpu: 0.0.40
codegen_flags: <defaults>
</compile_context>

<pallas_src>
import jax
import jax.numpy as jnp
from jax import lax
from jax.experimental import pallas as pl
from jax.experimental.pallas import tpu as pltpu


# ---------------------------------------------------------------------------
# Kernel: one (batch, row-tile, col-tile) block, output already pixel-shuffled.
# ---------------------------------------------------------------------------
def _convT_fused_kernel(x_ref, s_ref, rs_ref, w_ref, o_ref):
    """Fused ConvTranspose2d(k=2, s=2) block.

    x_ref : (1, Cin, h_t, w_t)      input tile (NCHW)
    s_ref : (w_t, 2*w_t)            col-stretch 0/1 matrix: (x @ S)[i, m] = x[i, m//2]
    rs_ref: (2*h_t, h_t)            row-stretch 0/1 matrix: (RS @ y)[I, m] = y[I//2, m]
    w_ref : (Cin, 2, Cout, 2*w_t)   lane-periodic weights: w_ref[c, di, k, m] = w[c, k, di, m%2]
    o_ref : (1, Cout, 2*h_t, 2*w_t) final-layout output tile
    """
    cin = x_ref.shape[1]
    _, cout, two_ht, two_wt = o_ref.shape

    S = s_ref[...]
    RS = rs_ref[...]
    # Output-row parity (di = I % 2), shared across channels / columns.
    row_even = (lax.broadcasted_iota(jnp.int32, (1, two_ht, two_wt), 1) % 2) == 0

    acc = jnp.zeros((cout, two_ht, two_wt), jnp.float32)
    # Cin is small for this module -> unrolled VPU broadcast-FMA over channels.
    # TODO(synk): for large Cin switch the channel contraction to the MXU
    #             (wmat @ x) with compact (non lane-expanded) weights.
    for c in range(cin):                                     # unrolled at trace time
        xc = x_ref[0, c]                                                  # (h_t, w_t)
        xs = jnp.dot(xc, S, preferred_element_type=jnp.float32)          # (h_t, 2*w_t)
        xs = jnp.dot(RS, xs, preferred_element_type=jnp.float32)         # (2*h_t, 2*w_t)
        w_even = w_ref[c, 0]                                              # (Cout, 2*w_t)
        w_odd = w_ref[c, 1]
        wmap = jnp.where(row_even, w_even[:, None, :], w_odd[:, None, :])
        acc = acc + wmap * xs[None, :, :]
    o_ref[0] = acc.astype(o_ref.dtype)


# ---------------------------------------------------------------------------
# Tile selection: VMEM-budgeted, (8,128)-aligned, megacore-friendly.
# ---------------------------------------------------------------------------
def _pick_tiles(h, w, cin, cout, n_batch, budget_bytes=8 << 20):
    # Column (lane) tile: prefer full width; tile only when wide, using
    # multiples of 128 that divide W (no ragged / masked edge blocks).
    w_t = w
    if w > 512:
        for t in (512, 256, 128):
            if w % t == 0:
                w_t = t
                break
    # Row (sublane) tile: multiple of 8 dividing H (caps the RS interleave
    # matmul at ~2*h_t MACs per output element); fall back to the full axis.
    h_t = h
    for t in (32, 16, 8):
        if h % t == 0:
            h_t = t
            break

    # Honor the VMEM budget for the double-buffered input + output blocks.
    def blocks_bytes(ht, wt):
        return 2 * 4 * (cin + 4 * cout) * ht * wt

    while blocks_bytes(h_t, w_t) > budget_bytes:
        if w_t >= 256 and w_t % 256 == 0 and w % (w_t // 2) == 0:
            w_t //= 2
        elif h_t >= 16 and h_t % 16 == 0 and h % (h_t // 2) == 0:
            h_t //= 2
        else:
            break  # cannot shrink further while keeping alignment

    # v7x megacore: expose >=2 blocks on a parallel axis when batch == 1.
    if n_batch == 1 and (h // h_t) * (w // w_t) < 2 and h % 16 == 0:
        h_t = h // 2
    return h_t, w_t


# ---------------------------------------------------------------------------
# Wrapper: builds the tiny constant matrices and launches one pallas_call.
# ---------------------------------------------------------------------------
@jax.jit
def conv_transpose_2x2(x, w):
    """x: (N, Cin, H, W) f32, w: (Cin, Cout, 2, 2) f32 (PyTorch ConvTranspose2d
    layout).  Returns (N, Cout, 2H, 2W) f32, identical to
    nn.ConvTranspose2d(Cin, Cout, kernel_size=2, stride=2, bias=False)(x)."""
    n, cin, h, wd = x.shape
    cout = w.shape[1]
    x = x.astype(jnp.float32)
    w = w.astype(jnp.float32)

    h_t, w_t = _pick_tiles(h, wd, cin, cout, n)

    # Column-stretch matrix: (x_tile @ S)[i, m] = x_tile[i, m // 2].
    S = (jnp.arange(w_t)[:, None] == (jnp.arange(2 * w_t) // 2)[None, :]
         ).astype(jnp.float32)
    # Row-stretch matrix: (RS @ y)[I, m] = y[I // 2, m].
    RS = ((jnp.arange(2 * h_t) // 2)[:, None] == jnp.arange(h_t)[None, :]
          ).astype(jnp.float32)
    # Lane-periodic weights: wsel[c, di, k, 2j+dj] = w[c, k, di, dj].
    wsel = jnp.tile(jnp.transpose(w, (0, 2, 1, 3)), (1, 1, 1, w_t))

    grid = (n, h // h_t, wd // w_t)
    return pl.pallas_call(
        _convT_fused_kernel,
        out_shape=jax.ShapeDtypeStruct((n, cout, 2 * h, 2 * wd), jnp.float32),
        grid_spec=pltpu.PrefetchScalarGridSpec(
            num_scalar_prefetch=0,
            grid=grid,
            in_specs=[
                pl.BlockSpec((1, cin, h_t, w_t), lambda b, i, j: (b, 0, i, j)),
                pl.BlockSpec((w_t, 2 * w_t), lambda b, i, j: (0, 0)),
                pl.BlockSpec((2 * h_t, h_t), lambda b, i, j: (0, 0)),
                pl.BlockSpec((cin, 2, cout, 2 * w_t),
                             lambda b, i, j: (0, 0, 0, 0)),
            ],
            out_specs=pl.BlockSpec((1, cout, 2 * h_t, 2 * w_t),
                                   lambda b, i, j: (b, 0, i, j)),
        ),
        compiler_params=pltpu.CompilerParams(
            dimension_semantics=("parallel", "parallel", "parallel"),
            vmem_limit_bytes=32 * 1024 * 1024),
    )(x, S, RS, wsel)


# ---------------------------------------------------------------------------
# Module wrapper mirroring the PyTorch ConvTranspose module.
# ---------------------------------------------------------------------------
class ConvTranspose:
    def __init__(self, in_channels, out_channels, key):
        fan_in = in_channels * 2 * 2
        bound = 1.0 / (fan_in ** 0.5)
        # nn.ConvTranspose2d weight layout: (in_channels, out_channels, kH, kW)
        self.weight = jax.random.uniform(
            key, (in_channels, out_channels, 2, 2), jnp.float32, -bound, bound)

    def __call__(self, x):
        return conv_transpose_2x2(x, self.weight)

    # pure-JAX reference for correctness checking
    def reference(self, x):
        y = jnp.einsum("ncij,ckab->nkiajb", x, self.weight)
        n, k, h, _, w, _ = y.shape
        return y.reshape(n, k, 2 * h, 2 * w)


if __name__ == "__main__":
    key = jax.random.PRNGKey(0)
    kx, kw1, kx2, kw2, kx3, kw3 = jax.random.split(key, 6)

    # ---- main case: N=2, Cin=4, H=W=16, Cout=8 -> output (2, 8, 32, 32)
    x = jax.random.normal(kx, (2, 4, 16, 16), jnp.float32)
    blk = ConvTranspose(in_channels=4, out_channels=8, key=kw1)
    out = jax.block_until_ready(blk(x))
    ref = blk.reference(x)
    assert out.shape == (2, 8, 32, 32), out.shape
    assert jnp.allclose(out, ref, atol=1e-5, rtol=1e-5), "convT 2x2 mismatch"

    # ---- odd channel counts, tiny spatial axis, N=1
    x2 = jax.random.normal(kx2, (1, 6, 8, 8), jnp.float32)
    blk2 = ConvTranspose(in_channels=6, out_channels=3, key=kw2)
    out2 = jax.block_until_ready(blk2(x2))
    assert out2.shape == (1, 3, 16, 16), out2.shape
    assert jnp.allclose(out2, blk2.reference(x2), atol=1e-5, rtol=1e-5), \
        "convT odd-shape mismatch"

    # ---- N=1 with row tiling exercised (megacore split path, 2 row tiles)
    x3 = jax.random.normal(kx3, (1, 3, 32, 16), jnp.float32)
    blk3 = ConvTranspose(in_channels=3, out_channels=5, key=kw3)
    out3 = jax.block_until_ready(blk3(x3))
    assert out3.shape == (1, 5, 64, 32), out3.shape
    assert jnp.allclose(out3, blk3.reference(x3), atol=1e-5, rtol=1e-5), \
        "convT tiled-rows mismatch"

    print("KERNEL_OK")
</pallas_src>

<mosaic_0001>
module attributes {stable_mosaic.version = 11 : i64} {
  func.func @_convT_fused_kernel(%arg0: i32, %arg1: i32, %arg2: i32, %arg3: memref<1x4x16x16xf32, #tpu.memory_space<vmem>>, %arg4: memref<16x32xf32, #tpu.memory_space<vmem>>, %arg5: memref<32x16xf32, #tpu.memory_space<vmem>>, %arg6: memref<4x2x8x32xf32, #tpu.memory_space<vmem>>, %arg7: memref<1x8x32x32xf32, #tpu.memory_space<vmem>>) attributes {dimension_semantics = [#tpu.dimension_semantics<parallel>, #tpu.dimension_semantics<parallel>, #tpu.dimension_semantics<parallel>], iteration_bounds = array<i64: 2, 1, 1>, scalar_prefetch = 0 : i64, scratch_operands = 0 : i64, tpu.core_type = #tpu.core_type<tc>, window_params = [{transform_indices = @transform_0, window_bounds = array<i64: 1, 4, 16, 16>}, {pipeline_mode = #tpu.pipeline_mode<synchronous>, transform_indices = @transform_1, window_bounds = array<i64: 16, 32>}, {pipeline_mode = #tpu.pipeline_mode<synchronous>, transform_indices = @transform_2, window_bounds = array<i64: 32, 16>}, {pipeline_mode = #tpu.pipeline_mode<synchronous>, transform_indices = @transform_3, window_bounds = array<i64: 4, 2, 8, 32>}, {transform_indices = @transform_4, window_bounds = array<i64: 1, 8, 32, 32>}]} {
    %c0 = arith.constant 0 : index
    %c0_0 = arith.constant 0 : index
    %0 = vector.load %arg4[%c0, %c0_0] : memref<16x32xf32, #tpu.memory_space<vmem>>, vector<16x32xf32>
    %c0_1 = arith.constant 0 : index
    %c0_2 = arith.constant 0 : index
    %1 = vector.load %arg5[%c0_1, %c0_2] : memref<32x16xf32, #tpu.memory_space<vmem>>, vector<32x16xf32>
    %2 = tpu.iota {dimensions = array<i32: 1>} : vector<1x32x32xi32>
    %c2_i32 = arith.constant 2 : i32
    %c0_i32 = arith.constant 0 : i32
    %3 = arith.cmpi eq, %c2_i32, %c0_i32 : i32
    %c1_i32 = arith.constant 1 : i32
    %4 = arith.select %3, %c1_i32, %c2_i32 : i32
    %5 = vector.broadcast %4 : i32 to vector<1x32x32xi32>
    %6 = arith.remsi %2, %5 : vector<1x32x32xi32>
    %c0_i32_3 = arith.constant 0 : i32
    %7 = vector.broadcast %c0_i32_3 : i32 to vector<1x32x32xi32>
    %8 = arith.cmpi ne, %6, %7 : vector<1x32x32xi32>
    %c0_i32_4 = arith.constant 0 : i32
    %9 = vector.broadcast %c0_i32_4 : i32 to vector<1x32x32xi32>
    %10 = arith.cmpi slt, %6, %9 : vector<1x32x32xi32>
    %c0_i32_5 = arith.constant 0 : i32
    %11 = arith.cmpi slt, %4, %c0_i32_5 : i32
    %12 = vector.broadcast %11 : i1 to vector<1x32x32xi1>
    %13 = vector.broadcast %12 : vector<1x32x32xi1> to vector<1x32x32xi1>
    %14 = arith.xori %10, %13 : vector<1x32x32xi1>
    %15 = arith.andi %14, %8 : vector<1x32x32xi1>
    %16 = vector.broadcast %4 : i32 to vector<1x32x32xi32>
    %17 = arith.addi %6, %16 : vector<1x32x32xi32>
    %18 = arith.select %15, %17, %6 : vector<1x32x32xi1>, vector<1x32x32xi32>
    %c0_i32_6 = arith.constant 0 : i32
    %19 = vector.broadcast %c0_i32_6 : i32 to vector<1x32x32xi32>
    %20 = arith.cmpi eq, %18, %19 : vector<1x32x32xi32>
    %cst = arith.constant 0.000000e+00 : f32
    %21 = vector.broadcast %cst : f32 to vector<8x32x32xf32>
    %c0_7 = arith.constant 0 : index
    %c0_8 = arith.constant 0 : index
    %c0_9 = arith.constant 0 : index
    %c0_10 = arith.constant 0 : index
    %22 = vector.load %arg3[%c0_7, %c0_8, %c0_9, %c0_10] : memref<1x4x16x16xf32, #tpu.memory_space<vmem>>, vector<1x1x16x16xf32>
    %23 = vector.shape_cast %22 : vector<1x1x16x16xf32> to vector<16x16xf32>
    %cst_11 = arith.constant dense<0.000000e+00> : vector<16x32xf32>
    %24 = tpu.matmul %23, %0, %cst_11 {dimension_numbers = #tpu.dot_dimension_numbers<[1], [0], [0], [1], [0, 0, 1, 1], [], []>} : vector<16x16xf32>, vector<16x32xf32>, vector<16x32xf32> -> vector<16x32xf32>
    %cst_12 = arith.constant dense<0.000000e+00> : vector<32x32xf32>
    %25 = tpu.matmul %1, %24, %cst_12 {dimension_numbers = #tpu.dot_dimension_numbers<[1], [0], [0], [1], [0, 0, 1, 1], [], []>} : vector<32x16xf32>, vector<16x32xf32>, vector<32x32xf32> -> vector<32x32xf32>
    %c0_13 = arith.constant 0 : index
    %c0_14 = arith.constant 0 : index
    %c0_15 = arith.constant 0 : index
    %c0_16 = arith.constant 0 : index
    %26 = vector.load %arg6[%c0_13, %c0_14, %c0_15, %c0_16] : memref<4x2x8x32xf32, #tpu.memory_space<vmem>>, vector<1x1x8x32xf32>
    %27 = vector.shape_cast %26 : vector<1x1x8x32xf32> to vector<8x32xf32>
    %c0_17 = arith.constant 0 : index
    %c1 = arith.constant 1 : index
    %c0_18 = arith.constant 0 : index
    %c0_19 = arith.constant 0 : index
    %28 = vector.load %arg6[%c0_17, %c1, %c0_18, %c0_19] : memref<4x2x8x32xf32, #tpu.memory_space<vmem>>, vector<1x1x8x32xf32>
    %29 = vector.shape_cast %28 : vector<1x1x8x32xf32> to vector<8x32xf32>
    %30 = vector.shape_cast %27 : vector<8x32xf32> to vector<8x1x32xf32>
    %31 = vector.shape_cast %29 : vector<8x32xf32> to vector<8x1x32xf32>
    %32 = vector.shape_cast %20 : vector<1x32x32xi1> to vector<1x32x32xi1>
    %33 = vector.broadcast %32 : vector<1x32x32xi1> to vector<8x32x32xi1>
    %34 = vector.shape_cast %30 : vector<8x1x32xf32> to vector<8x1x32xf32>
    %35 = vector.broadcast %34 : vector<8x1x32xf32> to vector<8x32x32xf32>
    %36 = vector.shape_cast %31 : vector<8x1x32xf32> to vector<8x1x32xf32>
    %37 = vector.broadcast %36 : vector<8x1x32xf32> to vector<8x32x32xf32>
    %38 = arith.select %33, %35, %37 : vector<8x32x32xi1>, vector<8x32x32xf32>
    %39 = vector.shape_cast %25 : vector<32x32xf32> to vector<1x32x32xf32>
    %40 = vector.broadcast %39 : vector<1x32x32xf32> to vector<8x32x32xf32>
    %41 = arith.mulf %38, %40 : vector<8x32x32xf32>
    %42 = arith.addf %21, %41 : vector<8x32x32xf32>
    %c0_20 = arith.constant 0 : index
    %c1_21 = arith.constant 1 : index
    %c0_22 = arith.constant 0 : index
    %c0_23 = arith.constant 0 : index
    %43 = vector.load %arg3[%c0_20, %c1_21, %c0_22, %c0_23] : memref<1x4x16x16xf32, #tpu.memory_space<vmem>>, vector<1x1x16x16xf32>
    %44 = vector.shape_cast %43 : vector<1x1x16x16xf32> to vector<16x16xf32>
    %cst_24 = arith.constant dense<0.000000e+00> : vector<16x32xf32>
    %45 = tpu.matmul %44, %0, %cst_24 {dimension_numbers = #tpu.dot_dimension_numbers<[1], [0], [0], [1], [0, 0, 1, 1], [], []>} : vector<16x16xf32>, vector<16x32xf32>, vector<16x32xf32> -> vector<16x32xf32>
    %cst_25 = arith.constant dense<0.000000e+00> : vector<32x32xf32>
    %46 = tpu.matmul %1, %45, %cst_25 {dimension_numbers = #tpu.dot_dimension_numbers<[1], [0], [0], [1], [0, 0, 1, 1], [], []>} : vector<32x16xf32>, vector<16x32xf32>, vector<32x32xf32> -> vector<32x32xf32>
    %c1_26 = arith.constant 1 : index
    %c0_27 = arith.constant 0 : index
    %c0_28 = arith.constant 0 : index
    %c0_29 = arith.constant 0 : index
    %47 = vector.load %arg6[%c1_26, %c0_27, %c0_28, %c0_29] : memref<4x2x8x32xf32, #tpu.memory_space<vmem>>, vector<1x1x8x32xf32>
    %48 = vector.shape_cast %47 : vector<1x1x8x32xf32> to vector<8x32xf32>
    %c1_30 = arith.constant 1 : index
    %c1_31 = arith.constant 1 : index
    %c0_32 = arith.constant 0 : index
    %c0_33 = arith.constant 0 : index
    %49 = vector.load %arg6[%c1_30, %c1_31, %c0_32, %c0_33] : memref<4x2x8x32xf32, #tpu.memory_space<vmem>>, vector<1x1x8x32xf32>
    %50 = vector.shape_cast %49 : vector<1x1x8x32xf32> to vector<8x32xf32>
    %51 = vector.shape_cast %48 : vector<8x32xf32> to vector<8x1x32xf32>
    %52 = vector.shape_cast %50 : vector<8x32xf32> to vector<8x1x32xf32>
    %53 = vector.shape_cast %20 : vector<1x32x32xi1> to vector<1x32x32xi1>
    %54 = vector.broadcast %53 : vector<1x32x32xi1> to vector<8x32x32xi1>
    %55 = vector.shape_cast %51 : vector<8x1x32xf32> to vector<8x1x32xf32>
    %56 = vector.broadcast %55 : vector<8x1x32xf32> to vector<8x32x32xf32>
    %57 = vector.shape_cast %52 : vector<8x1x32xf32> to vector<8x1x32xf32>
    %58 = vector.broadcast %57 : vector<8x1x32xf32> to vector<8x32x32xf32>
    %59 = arith.select %54, %56, %58 : vector<8x32x32xi1>, vector<8x32x32xf32>
    %60 = vector.shape_cast %46 : vector<32x32xf32> to vector<1x32x32xf32>
    %61 = vector.broadcast %60 : vector<1x32x32xf32> to vector<8x32x32xf32>
    %62 = arith.mulf %59, %61 : vector<8x32x32xf32>
    %63 = arith.addf %42, %62 : vector<8x32x32xf32>
    %c0_34 = arith.constant 0 : index
    %c2 = arith.constant 2 : index
    %c0_35 = arith.constant 0 : index
    %c0_36 = arith.constant 0 : index
    %64 = vector.load %arg3[%c0_34, %c2, %c0_35, %c0_36] : memref<1x4x16x16xf32, #tpu.memory_space<vmem>>, vector<1x1x16x16xf32>
    %65 = vector.shape_cast %64 : vector<1x1x16x16xf32> to vector<16x16xf32>
    %cst_37 = arith.constant dense<0.000000e+00> : vector<16x32xf32>
    %66 = tpu.matmul %65, %0, %cst_37 {dimension_numbers = #tpu.dot_dimension_numbers<[1], [0], [0], [1], [0, 0, 1, 1], [], []>} : vector<16x16xf32>, vector<16x32xf32>, vector<16x32xf32> -> vector<16x32xf32>
    %cst_38 = arith.constant dense<0.000000e+00> : vector<32x32xf32>
    %67 = tpu.matmul %1, %66, %cst_38 {dimension_numbers = #tpu.dot_dimension_numbers<[1], [0], [0], [1], [0, 0, 1, 1], [], []>} : vector<32x16xf32>, vector<16x32xf32>, vector<32x32xf32> -> vector<32x32xf32>
    %c2_39 = arith.constant 2 : index
    %c0_40 = arith.constant 0 : index
    %c0_41 = arith.constant 0 : index
    %c0_42 = arith.constant 0 : index
    %68 = vector.load %arg6[%c2_39, %c0_40, %c0_41, %c0_42] : memref<4x2x8x32xf32, #tpu.memory_space<vmem>>, vector<1x1x8x32xf32>
    %69 = vector.shape_cast %68 : vector<1x1x8x32xf32> to vector<8x32xf32>
    %c2_43 = arith.constant 2 : index
    %c1_44 = arith.constant 1 : index
    %c0_45 = arith.constant 0 : index
    %c0_46 = arith.constant 0 : index
    %70 = vector.load %arg6[%c2_43, %c1_44, %c0_45, %c0_46] : memref<4x2x8x32xf32, #tpu.memory_space<vmem>>, vector<1x1x8x32xf32>
    %71 = vector.shape_cast %70 : vector<1x1x8x32xf32> to vector<8x32xf32>
    %72 = vector.shape_cast %69 : vector<8x32xf32> to vector<8x1x32xf32>
    %73 = vector.shape_cast %71 : vector<8x32xf32> to vector<8x1x32xf32>
    %74 = vector.shape_cast %20 : vector<1x32x32xi1> to vector<1x32x32xi1>
    %75 = vector.broadcast %74 : vector<1x32x32xi1> to vector<8x32x32xi1>
    %76 = vector.shape_cast %72 : vector<8x1x32xf32> to vector<8x1x32xf32>
    %77 = vector.broadcast %76 : vector<8x1x32xf32> to vector<8x32x32xf32>
    %78 = vector.shape_cast %73 : vector<8x1x32xf32> to vector<8x1x32xf32>
    %79 = vector.broadcast %78 : vector<8x1x32xf32> to vector<8x32x32xf32>
    %80 = arith.select %75, %77, %79 : vector<8x32x32xi1>, vector<8x32x32xf32>
    %81 = vector.shape_cast %67 : vector<32x32xf32> to vector<1x32x32xf32>
    %82 = vector.broadcast %81 : vector<1x32x32xf32> to vector<8x32x32xf32>
    %83 = arith.mulf %80, %82 : vector<8x32x32xf32>
    %84 = arith.addf %63, %83 : vector<8x32x32xf32>
    %c0_47 = arith.constant 0 : index
    %c3 = arith.constant 3 : index
    %c0_48 = arith.constant 0 : index
    %c0_49 = arith.constant 0 : index
    %85 = vector.load %arg3[%c0_47, %c3, %c0_48, %c0_49] : memref<1x4x16x16xf32, #tpu.memory_space<vmem>>, vector<1x1x16x16xf32>
    %86 = vector.shape_cast %85 : vector<1x1x16x16xf32> to vector<16x16xf32>
    %cst_50 = arith.constant dense<0.000000e+00> : vector<16x32xf32>
    %87 = tpu.matmul %86, %0, %cst_50 {dimension_numbers = #tpu.dot_dimension_numbers<[1], [0], [0], [1], [0, 0, 1, 1], [], []>} : vector<16x16xf32>, vector<16x32xf32>, vector<16x32xf32> -> vector<16x32xf32>
    %cst_51 = arith.constant dense<0.000000e+00> : vector<32x32xf32>
    %88 = tpu.matmul %1, %87, %cst_51 {dimension_numbers = #tpu.dot_dimension_numbers<[1], [0], [0], [1], [0, 0, 1, 1], [], []>} : vector<32x16xf32>, vector<16x32xf32>, vector<32x32xf32> -> vector<32x32xf32>
    %c3_52 = arith.constant 3 : index
    %c0_53 = arith.constant 0 : index
    %c0_54 = arith.constant 0 : index
    %c0_55 = arith.constant 0 : index
    %89 = vector.load %arg6[%c3_52, %c0_53, %c0_54, %c0_55] : memref<4x2x8x32xf32, #tpu.memory_space<vmem>>, vector<1x1x8x32xf32>
    %90 = vector.shape_cast %89 : vector<1x1x8x32xf32> to vector<8x32xf32>
    %c3_56 = arith.constant 3 : index
    %c1_57 = arith.constant 1 : index
    %c0_58 = arith.constant 0 : index
    %c0_59 = arith.constant 0 : index
    %91 = vector.load %arg6[%c3_56, %c1_57, %c0_58, %c0_59] : memref<4x2x8x32xf32, #tpu.memory_space<vmem>>, vector<1x1x8x32xf32>
    %92 = vector.shape_cast %91 : vector<1x1x8x32xf32> to vector<8x32xf32>
    %93 = vector.shape_cast %90 : vector<8x32xf32> to vector<8x1x32xf32>
    %94 = vector.shape_cast %92 : vector<8x32xf32> to vector<8x1x32xf32>
    %95 = vector.shape_cast %20 : vector<1x32x32xi1> to vector<1x32x32xi1>
    %96 = vector.broadcast %95 : vector<1x32x32xi1> to vector<8x32x32xi1>
    %97 = vector.shape_cast %93 : vector<8x1x32xf32> to vector<8x1x32xf32>
    %98 = vector.broadcast %97 : vector<8x1x32xf32> to vector<8x32x32xf32>
    %99 = vector.shape_cast %94 : vector<8x1x32xf32> to vector<8x1x32xf32>
    %100 = vector.broadcast %99 : vector<8x1x32xf32> to vector<8x32x32xf32>
    %101 = arith.select %96, %98, %100 : vector<8x32x32xi1>, vector<8x32x32xf32>
    %102 = vector.shape_cast %88 : vector<32x32xf32> to vector<1x32x32xf32>
    %103 = vector.broadcast %102 : vector<1x32x32xf32> to vector<8x32x32xf32>
    %104 = arith.mulf %101, %103 : vector<8x32x32xf32>
    %105 = arith.addf %84, %104 : vector<8x32x32xf32>
    %c0_60 = arith.constant 0 : index
    %c0_61 = arith.constant 0 : index
    %c0_62 = arith.constant 0 : index
    %c0_63 = arith.constant 0 : index
    %106 = vector.load %arg7[%c0_60, %c0_61, %c0_62, %c0_63] : memref<1x8x32x32xf32, #tpu.memory_space<vmem>>, vector<1x8x32x32xf32>
    %107 = vector.shape_cast %106 : vector<1x8x32x32xf32> to vector<8x32x32xf32>
    %108 = vector.shape_cast %105 : vector<8x32x32xf32> to vector<1x8x32x32xf32>
    tpu.vector_store %arg7[%c0_60, %c0_61, %c0_62, %c0_63], %108 {strides = array<i32>} : memref<1x8x32x32xf32, #tpu.memory_space<vmem>>, vector<1x8x32x32xf32>,
    return
  }
  func.func @transform_0(%arg0: i32, %arg1: i32, %arg2: i32) -> (i32, i32, i32, i32) {
    %c0_i32 = arith.constant 0 : i32
    %c0_i32_0 = arith.constant 0 : i32
    return %arg0, %c0_i32, %arg1, %arg2 : i32, i32, i32, i32
  }
  func.func @transform_1(%arg0: i32, %arg1: i32, %arg2: i32) -> (i32, i32) {
    %c0_i32 = arith.constant 0 : i32
    %c0_i32_0 = arith.constant 0 : i32
    %c0_i32_1 = arith.constant 0 : i32
    return %c0_i32, %c0_i32_0 : i32, i32
  }
  func.func @transform_2(%arg0: i32, %arg1: i32, %arg2: i32) -> (i32, i32) {
    %c0_i32 = arith.constant 0 : i32
    %c0_i32_0 = arith.constant 0 : i32
    %c0_i32_1 = arith.constant 0 : i32
    return %c0_i32, %c0_i32_0 : i32, i32
  }
  func.func @transform_3(%arg0: i32, %arg1: i32, %arg2: i32) -> (i32, i32, i32, i32) {
    %c0_i32 = arith.constant 0 : i32
    %c0_i32_0 = arith.constant 0 : i32
    %c0_i32_1 = arith.constant 0 : i32
    %c0_i32_2 = arith.constant 0 : i32
    %c0_i32_3 = arith.constant 0 : i32
    return %c0_i32, %c0_i32_0, %c0_i32_1, %c0_i32_2 : i32, i32, i32, i32
  }
  func.func @transform_4(%arg0: i32, %arg1: i32, %arg2: i32) -> (i32, i32, i32, i32) {
    %c0_i32 = arith.constant 0 : i32
    %c0_i32_0 = arith.constant 0 : i32
    return %arg0, %c0_i32, %arg1, %arg2 : i32, i32, i32, i32
  }
}

</mosaic_0001>

<bundles_post_ra>
// kernel: conv_transpose_2x2.1
= control target key start
LH: loop header
LB: loop body
LE: loop exit
PB: predicated region body
PF: predicated region fallthrough
CT: control target
= control target key end

     0   :  { %9 = vsyncpa [#allocation3], 0  ;;  %s4409_s0 = inlined_call_operand.vmem [shape: f32[2,4,16,16], index: 0, kind: input, shape index: {}]   ;;  %s4410_s1 = inlined_call_operand.vmem [shape: f32[16,32], index: 1, kind: input, shape index: {}]   ;;  %s4411_s2 = inlined_call_operand.vmem [shape: f32[32,16], index: 2, kind: input, shape index: {}]   ;;  %s4412_s3 = inlined_call_operand.vmem [shape: f32[4,2,8,32], index: 3, kind: input, shape index: {}]   ;;  %s4413_s4 = inlined_call_operand.hbm [shape: f32[2,8,32,32], index: 4, kind: output, shape index: {}]  }
   0x1   :  { %11 = vsyncpa [#allocation3 + $0x1], 0  ;;  %s2594_s15 = smov 0   ;;  %s2596_s16 = smov 0  }
   0x2   :  { %s2598_s17 = smov 0   ;;  %s2600_s18 = smov 0  }
   0x3   :  { %s2602_s19 = smov 0   ;;  %s2604_s20 = smov 0  }
   0x4 LB: > { %s2261_s21 = sadd.s32 4294967295, %s2563_s20   ;;  %s2262_s22 = sadd.s32 4294967294, %s2563_s20   ;;  %s2563_s20 = sphi %s2604_s20, %s17_s20   ;;  %s2559_s19 = sphi %s2602_s19, %s4646_s19   ;;  %s2555_s18 = sphi %s2600_s18, %s4645_s18   ;;  %s2551_s17 = sphi %s2598_s17, %s4644_s17   ;;  %s2547_s16 = sphi %s2596_s16, %s4643_s16   ;;  %s2543_s15 = sphi %s2594_s15, %s4642_s15  }
   0x5   : > { %s36_s23 = sadd.s32 1, %s2559_s19  ;;  %s140_s24 = sadd.s32 1, %s2551_s17 }
   0x6   : > { %p38_p0 = scmp.ge.s32.totalorder %s36_s23, 2  ;;  %p150_p1 = scmp.ne.s32.totalorder %s2551_s17, %s2547_s16 }
   0x7   : > { %p151_p2 = scmp.eq.s32.totalorder %s2261_s21, 1  ;;  %p156_p3 = scmp.ne.s32.totalorder %s2547_s16, %s2543_s15 }
   0x8   : > { %s4648_s23 = smov (%p38_p0, %s36_s23), 0  ;;  %p157_p5 = scmp.eq.s32.totalorder %s2262_s22, 1 }
   0x9   : > { %p2634_p4 = por %p151_p2, %p150_p1  ;;  %s133_s26 = ssub.s32 %s2559_s19, %s4648_s23 }
   0xa   : > { %p2265_p6 = scmp.ge.s32.totalorder %s2563_s20, 1  ;;  %p138_p7 = scmp.eq.s32.totalorder %s133_s26, 0 }
   0xb   : > { %p2641_p8 = por %p157_p5, %p156_p3  ;;  %p200_p9 = scmp.lt.s32.totalorder %s2563_s20, 3 }
   0xc   : > { %s2647_s28 = scalar_select %p138_p7, %s2551_s17, %s140_s24  }
   0xd   : > { %p201_p10 = pnand %p2265_p6, %p200_p9 }
   0xf   : > { %204 = sbr.rel (%p201_p10) target bundleno = 698 (0x2ba), region = 36 }
  0x14   : > { %v248_v0 = vld [vmem:[%s4410_s1 + $0x8] sm:$0xff]  ;;  %v247_v1 = vld [vmem:[%s4410_s1] sm:$0xff]  ;;  %p234_p11 = scmp.lt.s32.totalorder %s2555_s18, 1  ;;  %vm312_vm0 = vcmask 130048   ;;  %v2683_v12 = vld [vmem:[%s4411_s2 + $0x10] sm:$0xff]  ;;  %v253_v18 = vlaneseq  ;;  %v4444_v56 = vmov 0 }
  0x15   : > { %2353 = vmatprep.subr.mxu1 %v248_v0  ;;  %2370 = vmatprep.subr.mxu0 %v248_v0  ;;  %v249_v6 = vld [vmem:[%s4411_s2] sm:$0xff]  ;;  %v2678_v11 = vld [vmem:[%s4411_s2 + $0x8] sm:$0xff]  ;;  %4441 = vst [vmem:[#allocation6_spill] sm:$0xff] %v2683_v12  ;;  %v2692_v13 = vld [vmem:[%s4411_s2 + $0x18] sm:$0xff]  ;;  %v2565_v19 = vmov 1966171168  }
  0x16   : > { %2354 = vmatpush3.msra.mxu1 %v248_v0  ;;  %2371 = vmatpush3.msra.mxu0 %v248_v0  ;;  %s235_s7 = scalar_select %p234_p11, %s2555_s18, 1  ;;  %4440 = vst [vmem:[#allocation5_spill] sm:$0xff] %v2678_v11  ;;  %4442 = vst [vmem:[#allocation7_spill] sm:$0xff] %v2692_v13  ;;  %v497_v20 = vunpack.c.l.s4 %v2565_v19  ;;  %v2712_v21 = vshrl.u32 %v253_v18, 7  ;;  %v491_v23 = vld [vmem:[%s4412_s3] sm:$0xff]  ;;  %v2275_v24 = vld [vmem:[%s4412_s3 + $0x8] sm:$0xff] }
  0x17   : > { %2355 = vmatprep.subr.mxu1 %v247_v1  ;;  %2372 = vmatprep.subr.mxu0 %v247_v1  ;;  %v495_v25 = vcombine.high %v491_v23, %v491_v23  ;;  %v545_v27 = vcombine.high %v2275_v24, %v2275_v24  ;;  %v2284_v28 = vld [vmem:[%s4412_s3 + $0x10] sm:$0xff]  ;;  %v2285_v31 = vld [vmem:[%s4412_s3 + $0x18] sm:$0xff]  ;;  %vm2125_vm5 = vcmask 261120   ;;  %s230_s30 = sand.u32 1, %s2547_s16   ;;  %s2566_s13 = smov [#allocation2]  }
  0x18   : > { %2356 = vmatpush3.msra.mxu1 %v247_v1  ;;  %s2311_s8 = sshll.u32 %s235_s7, 6  ;;  %2373 = vmatpush3.msra.mxu0 %v247_v1  ;;  %v498_v22 = vunpack.c.0.s8 %v497_v20  ;;  %v952_v34 = vcombine.high %v2284_v28, %v2284_v28  ;;  %v255_v35 = vadd.s32 8, %v2712_v21  ;;  %v1002_v36 = vcombine.high %v2285_v31, %v2285_v31  ;;  %s2266_s5 = sshll.u32 %s230_s30, 8 }
  0x19   : > { %s2660_s11 = scalar_lea.vmem %s4409_s0, %s2311_s8  ;;  %v2751_v57 = vsub.s32 0, %v2712_v21  ;;  %s4023_s6 = scalar_lea.vmem [#allocation2], %s2266_s5 }
  0x1a   : > { %v310_v2 = vld [vmem:[%s2660_s11] sm:$0xff]  ;;  %v2276_v3 = vld [vmem:[%s2660_s11 + $0x10] sm:$0xff]  ;;  %v311_v4 = vld [vmem:[%s2660_s11 + $0x8] sm:$0xff]  ;;  %v2721_v26 = vsub.s32 %v498_v22, %v2712_v21  ;;  %v269_v43 = vand.u32 1, %v255_v35  ;;  %s2312_s7 = sshll.u32 %s2555_s18, 12  ;;  %s2175_s8 = sshll.u32 %s4023_s6, 4  ;;  %s4344_s8 = int_to_ptr.vmem [resolvable:$true] %s2175_s8 }
  0x1b   : > { %2357 = vmatprep.mubr.msk.f32.mxu1 %vm312_vm0, %v310_v2  ;;  %2374 = vmatprep.mubr.msk.f32.mxu0 %vm312_vm0, %v2276_v3  ;;  %v2277_v5 = vld [vmem:[%s2660_s11 + $0x18] sm:$0xff]  ;;  %v2286_v14 = vld [vmem:[%s2660_s11 + $0x20] sm:$0xff]  ;;  %v2296_v15 = vld [vmem:[%s2660_s11 + $0x30] sm:$0xff]  ;;  %4447 = vst [vmem:[#allocation10_spill] sm:$0xff] %v2751_v57  ;;  %s4342_s10 = scalar_lea.hbm %s4413_s4, %s2312_s7  ;;  %s2487_s12 = scalar_lea.vmem %s4344_s8, 4096 }
  0x1c   : > { %2358 = vmatmul.mubr.msk.f32.vlgmr.msra.gmra.mxu1 %vm312_vm0, %v311_v4  ;;  %2375 = vmatmul.mubr.msk.f32.vlgmr.msra.gmra.mxu0 %vm312_vm0, %v2277_v5  ;;  %v2287_v16 = vld [vmem:[%s2660_s11 + $0x28] sm:$0xff]  ;;  %v2297_v17 = vld [vmem:[%s2660_s11 + $0x38] sm:$0xff]  ;;  %4443 = vst [vmem:[#allocation8_spill] sm:$0xff] %v2721_v26  ;;  %v502_v29 = vrot.slane %v491_v23, %v2721_v26  ;;  %v509_v30 = vrot.slane %v495_v25, %v2721_v26  ;;  %vm2746_vm1 = vcmp.eq.s32.totalorder %v269_v43, 0  ;;  %s4364_s11 = scalar_lea.sflag [#allocation3], %s230_s30  ;;  %p2488_p12 = scmp.ne.s32.totalorder %s4344_s8, %s2487_s12 }
  0x1d   : > { %2364 = vmatprep.mubr.msk.f32.mxu1 %vm312_vm0, %v249_v6  ;;  %2381 = vmatprep.mubr.msk.f32.mxu0 %vm312_vm0, %v249_v6  ;;  %v552_v32 = vrot.slane %v2275_v24, %v2721_v26  ;;  %v559_v33 = vrot.slane %v545_v27, %v2721_v26  ;;  %v959_v41 = vrot.slane %v2284_v28, %v2721_v26  ;;  %v4445_v56 = vsel %vm2746_vm1, 4294967295, %v4444_v56  ;;  %s2491_s14 = sshll.u32 %s2566_s13, 4  ;;  %s2492_s14 = int_to_ptr.vmem [resolvable:$false] %s2491_s14 }
  0x1e   : > { %v510_v37 = vcombine.high %v502_v29, %v502_v29  ;;  %v511_v38 = vcombine.high %v509_v30, %v509_v30  ;;  %v966_v42 = vrot.slane %v952_v34, %v2721_v26  ;;  %v1009_v44 = vrot.slane %v2285_v31, %v2721_v26  ;;  %4446 = vst [vmem:[#allocation9_spill] sm:$0xff] %v4445_v56  ;;  %p2489_p13 = pnand %p2488_p12, %p2634_p4  ;;  %s2493_s21 = scalar_lea.vmem %s2492_s14, 8192 }
  0x1f   : > { %v560_v39 = vcombine.high %v552_v32, %v552_v32  ;;  %v561_v40 = vcombine.high %v559_v33, %v559_v33  ;;  %v1016_v45 = vrot.slane %v1002_v36, %v2721_v26  ;;  %v518_v46 = vrot.slane %v502_v29, %v2721_v26  ;;  %p2494_p1 = scmp.lt.s32.totalorder %s4344_s8, %s2492_s14  ;;  %p2495_p2 = scmp.lt.s32.totalorder %s2493_s21, %s2487_s12 }
  0x20   : > { %v525_v47 = vrot.slane %v509_v30, %v2721_v26  ;;  %v532_v48 = vrot.slane %v510_v37, %v2721_v26  ;;  %v539_v49 = vrot.slane %v511_v38, %v2721_v26  ;;  %v568_v50 = vrot.slane %v552_v32, %v2721_v26  ;;  %p2490_p0 = pneg %p2489_p13 }
  0x21   : > { %v575_v51 = vrot.slane %v559_v33, %v2721_v26  ;;  %v582_v52 = vrot.slane %v560_v39, %v2721_v26  ;;  %v589_v53 = vrot.slane %v561_v40, %v2721_v26  ;;  %v967_v54 = vcombine.high %v959_v41, %v959_v41  ;;  %p2496_p3 = por %p2495_p2, %p2494_p1 }
  0x22   : > { %v968_v55 = vcombine.high %v966_v42, %v966_v42  ;;  %v1017_v58 = vcombine.high %v1009_v44, %v1009_v44  ;;  %v1018_v59 = vcombine.high %v1016_v45, %v1016_v45  ;;  %v540_v60 = vcombine.high %v518_v46, %v518_v46 }
  0x23   : > { %v541_v61 = vcombine.high %v525_v47, %v525_v47  ;;  %v542_v62 = vcombine.high %v532_v48, %v532_v48  ;;  %v543_v63 = vcombine.high %v539_v49, %v539_v49  ;;  %v592_v2 = vcombine.high %v582_v52, %v582_v52  ;;  %p2497_p5 = pnand %p2496_p3, %p2490_p0 }
  0x24   : > { %v593_v3 = vcombine.high %v589_v53, %v589_v53  ;;  %v975_v4 = vrot.slane %v959_v41, %v2721_v26  ;;  %v982_v5 = vrot.slane %v966_v42, %v2721_v26  ;;  %v2773_v18 = vrot.slane %v568_v50, %v2751_v57 }
  0x25   : > { %v2776_v19 = vrot.slane %v525_v47, %v2751_v57  ;;  %v2779_v20 = vrot.slane %v582_v52, %v2751_v57  ;;  %v2785_v23 = vrot.slane %v592_v2, %v2751_v57  ;;  %v2788_v24 = vrot.slane %v539_v49, %v2751_v57 }
  0x26   : > { %v2791_v25 = vrot.slane %v541_v61, %v2751_v57  ;;  %v2794_v27 = vrot.slane %v543_v63, %v2751_v57  ;;  %v2797_v28 = vrot.slane %v575_v51, %v2751_v57  ;;  %v2800_v29 = vrot.slane %v589_v53, %v2751_v57 }
  0x27   : > { %v997_v30 = vcombine.high %v975_v4, %v975_v4  ;;  %v1046_v32 = vrot.slane %v1018_v59, %v2721_v26  ;;  %v2807_v34 = vrot.slane %v593_v3, %v2751_v57  ;;  %v998_v36 = vcombine.high %v982_v5, %v982_v5 }
  0x28   : > { %v2838_v49 = vrot.slane %v982_v5, %v2751_v57  ;;  %v262_v52 = vand.u32 1, %v2712_v21  ;;  %v699_v63 = vsel %vm2746_vm1, %v2776_v19, %v2797_v28  ;;  %v256_v2 = vadd.s32 16, %v2712_v21 }
  0x29   : > { %v2832_v47 = vrot.slane %v997_v30, %v2751_v57  ;;  %v2864_v61 = vrot.slane %v1046_v32, %v2751_v57  ;;  %v703_v3 = vsel %vm2746_vm1, %v2788_v24, %v2800_v29  ;;  %v711_v5 = vsel %vm2746_vm1, %v2794_v27, %v2807_v34 }
  0x2a   : > { %vm2892_vm2 = vcmp.eq.s32.totalorder %v262_v52, 0  ;;  %v4454_v52 = vmov 0 }
  0xdc   : > { %v2359_v7 = vpop.f32.mrf.mxu1  ;;  %v2376_v8 = vpop.f32.mrf.mxu0 }
  0xdd   : > { %2360 = vmatprep.subr.mxu1 %v2359_v7  ;;  %2377 = vmatprep.subr.mxu0 %v2376_v8 }
  0xde   : > { %v385_v9 = vpop.f32.mrf.mxu1  ;;  %2361 = vmatpush3.msra.mxu1 %v2359_v7  ;;  %v853_v10 = vpop.f32.mrf.mxu0  ;;  %2378 = vmatpush3.msra.mxu0 %v2376_v8  ;;  %v996_v7 = vrot.slane %v968_v55, %v2721_v26  ;;  %v2758_v8 = vrot.slane %v518_v46, %v2751_v57 }
  0xdf   : > { %2362 = vmatprep.subr.mxu1 %v385_v9  ;;  %2379 = vmatprep.subr.mxu0 %v853_v10 }
  0xe0   : > { %2363 = vmatpush3.msra.mxu1 %v385_v9  ;;  %2380 = vmatpush3.msra.mxu0 %v853_v10  ;;  %v1025_v9 = vrot.slane %v1009_v44, %v2721_v26  ;;  %v1032_v10 = vrot.slane %v1016_v45, %v2721_v26  ;;  %v683_v35 = vsel %vm2746_vm1, %v2758_v8, %v2773_v18 }
  0xe1   : > { %2365 = vmatmul.mubr.msk.f32.vlgmr.msra.gmra.mxu1 %vm312_vm0, %v2678_v11  ;;  %2382 = vmatmul.mubr.msk.f32.vlgmr.msra.gmra.mxu0 %vm312_vm0, %v2678_v11  ;;  %v1000_v41 = vcombine.high %v996_v7, %v996_v7  ;;  %v2826_v44 = vrot.slane %v975_v4, %v2751_v57  ;;  %v1050_v45 = vcombine.high %v1046_v32, %v1046_v32 }
  0xe2   : > { %2387 = vmatprep.subr.mxu1 %v248_v0  ;;  %2404 = vmatprep.subr.mxu0 %v248_v0  ;;  %v1047_v40 = vcombine.high %v1025_v9, %v1025_v9  ;;  %v1048_v42 = vcombine.high %v1032_v10, %v1032_v10  ;;  %v2848_v53 = vrot.slane %v1025_v9, %v2751_v57 }
  0xe3   : > { %2388 = vmatpush3.msra.mxu1 %v248_v0  ;;  %2367 = vmatprep.mubr.msk.f32.mxu1 %vm312_vm0, %v2683_v12 }
  0xe4   : > { %2384 = vmatprep.mubr.msk.f32.mxu0 %vm312_vm0, %v2683_v12  ;;  %2405 = vmatpush3.msra.mxu0 %v248_v0  ;;  %v590_v0 = vcombine.high %v568_v50, %v568_v50  ;;  %v2841_v50 = vrot.slane %v996_v7, %v2751_v57  ;;  %v2854_v55 = vrot.slane %v1047_v40, %v2751_v57 }
  0xe5   : > { %2368 = vmatmul.mubr.msk.f32.gmra.mxu1 %vm312_vm0, %v2692_v13  ;;  %2385 = vmatmul.mubr.msk.f32.gmra.mxu0 %vm312_vm0, %v2692_v13 }
  0xe6   : > { %2389 = vmatprep.subr.mxu1 %v247_v1  ;;  %2406 = vmatprep.subr.mxu0 %v247_v1  ;;  %v2782_v22 = vrot.slane %v590_v0, %v2751_v57  ;;  %v2874_v0 = vrot.slane %v1000_v41, %v2751_v57  ;;  %v1140_v9 = vsel %vm2746_vm1, %v2832_v47, %v2854_v55 }
  0xe7   : > { %2390 = vmatpush3.msra.mxu1 %v247_v1  ;;  %2391 = vmatprep.mubr.msk.f32.mxu1 %vm312_vm0, %v2286_v14  ;;  %v1039_v14 = vrot.slane %v1017_v58, %v2721_v26  ;;  %v257_v58 = vadd.s32 24, %v2712_v21  ;;  %v1132_v21 = vsel %vm2746_vm1, %v2826_v44, %v2848_v53 }
  0xe8   : > { %2407 = vmatpush3.msra.mxu0 %v247_v1  ;;  %2408 = vmatprep.mubr.msk.f32.mxu0 %vm312_vm0, %v2296_v15  ;;  %v591_v1 = vcombine.high %v575_v51, %v575_v51  ;;  %v2764_v15 = vrot.slane %v532_v48, %v2751_v57  ;;  %v2844_v51 = vrot.slane %v998_v36, %v2751_v57 }
  0xe9   : > { %2392 = vmatmul.mubr.msk.f32.vlgmr.msra.gmra.mxu1 %vm312_vm0, %v2287_v16  ;;  %2409 = vmatmul.mubr.msk.f32.vlgmr.msra.gmra.mxu0 %vm312_vm0, %v2297_v17  ;;  %v2767_v16 = vrot.slane %v540_v60, %v2751_v57  ;;  %v2770_v17 = vrot.slane %v542_v62, %v2751_v57  ;;  %v1049_v43 = vcombine.high %v1039_v14, %v1039_v14 }
  0xea   : > { %2398 = vmatprep.mubr.msk.f32.mxu1 %vm312_vm0, %v249_v6  ;;  %2415 = vmatprep.mubr.msk.f32.mxu0 %vm312_vm0, %v249_v6  ;;  %v989_v6 = vrot.slane %v967_v54, %v2721_v26  ;;  %v2804_v33 = vrot.slane %v591_v1, %v2751_v57  ;;  %v687_v37 = vsel %vm2746_vm1, %v2764_v15, %v2779_v20 }
  0xeb   : > { %v691_v38 = vsel %vm2746_vm1, %v2767_v16, %v2782_v22  ;;  %v695_v39 = vsel %vm2746_vm1, %v2770_v17, %v2785_v23  ;;  %v2851_v54 = vrot.slane %v1039_v14, %v2751_v57  ;;  %v2858_v59 = vrot.slane %v1049_v43, %v2751_v57 }
  0xec   : > { %v999_v31 = vcombine.high %v989_v6, %v989_v6  ;;  %v2829_v46 = vrot.slane %v989_v6, %v2751_v57  ;;  %v2861_v60 = vrot.slane %v1032_v10, %v2751_v57  ;;  %v2867_v62 = vrot.slane %v1048_v42, %v2751_v57 }
  0xed   : > { %v2877_v1 = vrot.slane %v1050_v45, %v2751_v57  ;;  %v707_v4 = vsel %vm2746_vm1, %v2791_v25, %v2804_v33  ;;  %v4448_v6 = vmov 0  ;;  %v283_v10 = vand.u32 1, %v257_v58 }
  0xee   : > { %v2835_v48 = vrot.slane %v999_v31, %v2751_v57  ;;  %v4449_v6 = vsel %vm2892_vm2, 4294967295, %v4448_v6  ;;  %v1136_v7 = vsel %vm2746_vm1, %v2829_v46, %v2851_v54  ;;  %v1148_v30 = vsel %vm2746_vm1, %v2838_v49, %v2861_v60 }
  0xef   : > { %4450 = vst [vmem:[#allocation11_spill] sm:$0xff] %v4449_v6  ;;  %v1152_v31 = vsel %vm2746_vm1, %v2841_v50, %v2864_v61  ;;  %v1156_v32 = vsel %vm2746_vm1, %v2844_v51, %v2867_v62  ;;  %v1160_v36 = vsel %vm2746_vm1, %v2874_v0, %v2877_v1  ;;  %v276_v42 = vand.u32 1, %v256_v2 }
  0xf0   : > { %v1144_v14 = vsel %vm2746_vm1, %v2835_v48, %v2858_v59  ;;  %vm2964_vm3 = vcmp.eq.s32.totalorder %v283_v10, 0  ;;  %v4451_v43 = vmov 0 }
  0xf1   : > { %v4452_v43 = vsel %vm2964_vm3, 4294967295, %v4451_v43  ;;  %vm2996_vm4 = vcmp.eq.s32.totalorder %v276_v42, 0 }
  0xf2   : > { %4453 = vst [vmem:[#allocation12_spill] sm:$0xff] %v4452_v43  ;;  %v4455_v52 = vsel %vm2996_vm4, 4294967295, %v4454_v52 }
  0xf3   : > { %4456 = vst [vmem:[#allocation13_spill] sm:$0xff] %v4455_v52 }
 0x1a1   : > { %v2366_v45 = vpop.f32.mrf.mxu1  ;;  %v2383_v41 = vpop.f32.mrf.mxu0 }
 0x1a2   : > { %v715_v10 = vmul.f32 %v2366_v45, %v683_v35  ;;  %v719_v58 = vmul.f32 %v2366_v45, %v687_v37  ;;  %v723_v2 = vmul.f32 %v2366_v45, %v691_v38  ;;  %v727_v42 = vmul.f32 %v2366_v45, %v695_v39 }
 0x1a3   : > { %v731_v35 = vmul.f32 %v2366_v45, %v699_v63  ;;  %v735_v37 = vmul.f32 %v2366_v45, %v703_v3  ;;  %v739_v38 = vmul.f32 %v2366_v45, %v707_v4  ;;  %v743_v39 = vmul.f32 %v2366_v45, %v711_v5  ;;  %v472_v40 = vpop.f32.mrf.mxu1  ;;  %v928_v63 = vpop.f32.mrf.mxu0 }
 0x1a4   : > { %v1164_v3 = vmul.f32 %v2383_v41, %v1132_v21  ;;  %v1168_v4 = vmul.f32 %v2383_v41, %v1136_v7  ;;  %v1172_v5 = vmul.f32 %v2383_v41, %v1140_v9  ;;  %v1176_v45 = vmul.f32 %v2383_v41, %v1144_v14 }
 0x1a5   : > { %v1180_v21 = vmul.f32 %v2383_v41, %v1148_v30  ;;  %v1184_v7 = vmul.f32 %v2383_v41, %v1152_v31  ;;  %v1188_v9 = vmul.f32 %v2383_v41, %v1156_v32  ;;  %v1192_v14 = vmul.f32 %v2383_v41, %v1160_v36  ;;  %v2369_v57 = vpop.f32.mrf.mxu1  ;;  %v2386_v30 = vpop.f32.mrf.mxu0 }
 0x1a6   : > { %v3208_v26 = vadd.f32 %v1164_v3, %v715_v10  ;;  %v3210_v13 = vadd.f32 %v1168_v4, %v719_v58  ;;  %v3212_v12 = vadd.f32 %v1172_v5, %v723_v2  ;;  %v3214_v31 = vadd.f32 %v1176_v45, %v727_v42 }
 0x1a7   : > { %v3216_v52 = vadd.f32 %v1180_v21, %v731_v35  ;;  %v3218_v11 = vadd.f32 %v1184_v7, %v735_v37  ;;  %v3220_v32 = vadd.f32 %v1188_v9, %v739_v38  ;;  %v3222_v56 = vadd.f32 %v1192_v14, %v743_v39  ;;  %v3224_v43 = vpop.f32.mrf.mxu1  ;;  %v3226_v36 = vpop.f32.mrf.mxu0 }
 0x1a8   : > { %4457 = vst [vmem:[#allocation14_spill] sm:$0xff] %v3208_v26  ;;  %4458 = vst [vmem:[#allocation15_spill] sm:$0xff] %v3210_v13  ;;  %v4467_v41 = vsel %vm2892_vm2, %v2758_v8, %v2773_v18  ;;  %v4468_v2 = vsel %vm2892_vm2, %v2764_v15, %v2779_v20  ;;  %v4469_v42 = vsel %vm2892_vm2, %v2767_v16, %v2782_v22 }
 0x1a9   : > { %4459 = vst [vmem:[#allocation16_spill] sm:$0xff] %v3212_v12  ;;  %4460 = vst [vmem:[#allocation17_spill] sm:$0xff] %v3214_v31  ;;  %v714_v58 = vmul.f32 %v4467_v41, %v472_v40  ;;  %v718_v10 = vmul.f32 %v4468_v2, %v472_v40  ;;  %v722_v35 = vmul.f32 %v4469_v42, %v472_v40  ;;  %v2393_v14 = vpop.f32.mrf.mxu1  ;;  %v2410_v41 = vpop.f32.mrf.mxu0 }
 0x1aa   : > { %4461 = vst [vmem:[#allocation18_spill] sm:$0xff] %v3216_v52  ;;  %4462 = vst [vmem:[#allocation19_spill] sm:$0xff] %v3218_v11  ;;  %v4470_v37 = vsel %vm2892_vm2, %v2770_v17, %v2785_v23  ;;  %v4471_v39 = vsel %vm2892_vm2, %v2776_v19, %v2797_v28  ;;  %v4472_v4 = vsel %vm2892_vm2, %v2788_v24, %v2800_v29  ;;  %2394 = vmatprep.subr.mxu1 %v2393_v14 }
 0x1ab   : > { %4463 = vst [vmem:[#allocation20_spill] sm:$0xff] %v3220_v32  ;;  %4464 = vst [vmem:[#allocation21_spill] sm:$0xff] %v3222_v56  ;;  %v726_v38 = vmul.f32 %v4470_v37, %v472_v40  ;;  %v730_v3 = vmul.f32 %v4471_v39, %v472_v40  ;;  %v734_v5 = vmul.f32 %v4472_v4, %v472_v40  ;;  %2411 = vmatprep.subr.mxu0 %v2410_v41  ;;  %v1751_v26 = vpop.f32.mrf.mxu0 }
 0x1ac   : > { %4465 = vst [vmem:[#allocation22_spill] sm:$0xff] %v3224_v43  ;;  %4466 = vst [vmem:[#allocation23_spill] sm:$0xff] %v3226_v36  ;;  %v4473_v45 = vsel %vm2892_vm2, %v2791_v25, %v2804_v33  ;;  %v4474_v7 = vsel %vm2892_vm2, %v2794_v27, %v2807_v34  ;;  %v4475_v2 = vsel %vm2892_vm2, %v2826_v44, %v2848_v53  ;;  %2395 = vmatpush3.msra.mxu1 %v2393_v14 }
 0x1ad   : > { %v738_v21 = vmul.f32 %v4473_v45, %v472_v40  ;;  %v742_v9 = vmul.f32 %v4474_v7, %v472_v40  ;;  %v1163_v42 = vmul.f32 %v4475_v2, %v928_v63  ;;  %v4476_v37 = vsel %vm2892_vm2, %v2829_v46, %v2851_v54  ;;  %2412 = vmatpush3.msra.mxu0 %v2410_v41 }
 0x1ae   : > { %v1167_v39 = vmul.f32 %v4476_v37, %v928_v63  ;;  %v4477_v4 = vsel %vm2892_vm2, %v2832_v47, %v2854_v55  ;;  %v4478_v45 = vsel %vm2892_vm2, %v2835_v48, %v2858_v59  ;;  %v4479_v2 = vsel %vm2892_vm2, %v2838_v49, %v2861_v60  ;;  %2413 = vmatprep.subr.mxu0 %v1751_v26 }
 0x1af   : > { %v1171_v40 = vmul.f32 %v4477_v4, %v928_v63  ;;  %v1175_v7 = vmul.f32 %v4478_v45, %v928_v63  ;;  %v1179_v56 = vmul.f32 %v4479_v2, %v928_v63  ;;  %v4480_v37 = vsel %vm2892_vm2, %v2841_v50, %v2864_v61  ;;  %v1302_v2 = vpop.f32.mrf.mxu1  ;;  %2414 = vmatpush3.msra.mxu0 %v1751_v26 }
 0x1b0   : > { %v1183_v32 = vmul.f32 %v4480_v37, %v928_v63  ;;  %v4481_v4 = vsel %vm2892_vm2, %v2844_v51, %v2867_v62  ;;  %v4482_v45 = vsel %vm2892_vm2, %v2874_v0, %v2877_v1  ;;  %v3308_v31 = vadd.f32 %v1163_v42, %v714_v58  ;;  %2396 = vmatprep.subr.mxu1 %v1302_v2 }
 0x1b1   : > { %v1187_v11 = vmul.f32 %v4481_v4, %v928_v63  ;;  %v1191_v52 = vmul.f32 %v4482_v45, %v928_v63  ;;  %v3310_v12 = vadd.f32 %v1167_v39, %v718_v10  ;;  %v3312_v13 = vadd.f32 %v1171_v40, %v722_v35  ;;  %2397 = vmatpush3.msra.mxu1 %v1302_v2 }
 0x1b2   : > { %v3314_v37 = vadd.f32 %v1175_v7, %v726_v38  ;;  %v3316_v36 = vadd.f32 %v1179_v56, %v730_v3  ;;  %v3318_v4 = vadd.f32 %v1183_v32, %v734_v5  ;;  %v4489_v58 = vsel %vm2964_vm3, %v2758_v8, %v2773_v18 }
 0x1b3   : > { %v3320_v6 = vadd.f32 %v1187_v11, %v738_v21  ;;  %v3322_v43 = vadd.f32 %v1191_v52, %v742_v9  ;;  %v717_v10 = vmul.f32 %v2369_v57, %v4489_v58  ;;  %v4490_v35 = vsel %vm2964_vm3, %v2764_v15, %v2779_v20  ;;  %v4514_v26 = vld [vmem:[#allocation22_spill] sm:$0xff] }
 0x1b4   : > { %4483 = vst [vmem:[#allocation24_spill] sm:$0xff] %v3314_v37  ;;  %4484 = vst [vmem:[#allocation25_spill] sm:$0xff] %v3316_v36  ;;  %v721_v56 = vmul.f32 %v2369_v57, %v4490_v35  ;;  %v4491_v11 = vsel %vm2964_vm3, %v2767_v16, %v2782_v22  ;;  %v4492_v32 = vsel %vm2964_vm3, %v2770_v17, %v2785_v23 }
 0x1b5   : > { %4485 = vst [vmem:[#allocation26_spill] sm:$0xff] %v3318_v4  ;;  %4486 = vst [vmem:[#allocation27_spill] sm:$0xff] %v3320_v6  ;;  %v725_v52 = vmul.f32 %v2369_v57, %v4491_v11  ;;  %v729_v38 = vmul.f32 %v2369_v57, %v4492_v32  ;;  %v4493_v3 = vsel %vm2964_vm3, %v2776_v19, %v2797_v28  ;;  %v4509_v6 = vld [vmem:[#allocation5_spill] sm:$0xff] }
 0x1b6   : > { %4487 = vst [vmem:[#allocation28_spill] sm:$0xff] %v3322_v43  ;;  %v733_v5 = vmul.f32 %v2369_v57, %v4493_v3  ;;  %v4494_v21 = vsel %vm2964_vm3, %v2788_v24, %v2800_v29  ;;  %v4495_v14 = vsel %vm2964_vm3, %v2791_v25, %v2804_v33  ;;  %v4496_v42 = vsel %vm2964_vm3, %v2794_v27, %v2807_v34 }
 0x1b7   : > { %v737_v9 = vmul.f32 %v2369_v57, %v4494_v21  ;;  %v741_v41 = vmul.f32 %v2369_v57, %v4495_v14  ;;  %v745_v39 = vmul.f32 %v2369_v57, %v4496_v42  ;;  %v4497_v40 = vsel %vm2964_vm3, %v2826_v44, %v2848_v53  ;;  %2399 = vmatmul.mubr.msk.f32.vlgmr.msra.gmra.mxu1 %vm312_vm0, %v4509_v6 }
 0x1b8   : > { %v1166_v7 = vmul.f32 %v2386_v30, %v4497_v40  ;;  %v4498_v45 = vsel %vm2964_vm3, %v2829_v46, %v2851_v54  ;;  %v4499_v35 = vsel %vm2964_vm3, %v2832_v47, %v2854_v55  ;;  %v4500_v57 = vsel %vm2964_vm3, %v2835_v48, %v2858_v59  ;;  %2416 = vmatmul.mubr.msk.f32.vlgmr.msra.gmra.mxu0 %vm312_vm0, %v4509_v6 }
 0x1b9   : > { %v1170_v58 = vmul.f32 %v2386_v30, %v4498_v45  ;;  %v1174_v11 = vmul.f32 %v2386_v30, %v4499_v35  ;;  %v1178_v32 = vmul.f32 %v2386_v30, %v4500_v57  ;;  %v4501_v3 = vsel %vm2964_vm3, %v2838_v49, %v2861_v60 }
 0x1ba   : > { %v1182_v21 = vmul.f32 %v2386_v30, %v4501_v3  ;;  %v4502_v14 = vsel %vm2964_vm3, %v2841_v50, %v2864_v61  ;;  %v4503_v40 = vsel %vm2964_vm3, %v2844_v51, %v2867_v62  ;;  %v4504_v2 = vsel %vm2964_vm3, %v2874_v0, %v2877_v1 }
 0x1bb   : > { %v1186_v42 = vmul.f32 %v2386_v30, %v4502_v14  ;;  %v1190_v45 = vmul.f32 %v2386_v30, %v4503_v40  ;;  %v1194_v35 = vmul.f32 %v2386_v30, %v4504_v2  ;;  %v3404_v57 = vadd.f32 %v1166_v7, %v717_v10 }
 0x1bc   : > { %v3406_v3 = vadd.f32 %v1170_v58, %v721_v56  ;;  %v3408_v43 = vadd.f32 %v1174_v11, %v725_v52  ;;  %v3410_v14 = vadd.f32 %v1178_v32, %v729_v38  ;;  %v3414_v4 = vadd.f32 %v1182_v21, %v733_v5 }
 0x1bd   : > { %4505 = vst [vmem:[#allocation29_spill] sm:$0xff] %v3404_v57  ;;  %v3416_v40 = vadd.f32 %v1186_v42, %v737_v9  ;;  %v3418_v36 = vadd.f32 %v1190_v45, %v741_v41  ;;  %v3420_v37 = vadd.f32 %v1194_v35, %v745_v39  ;;  %v4516_v10 = vsel %vm2996_vm4, %v2758_v8, %v2773_v18  ;;  %v4520_v9 = vld [vmem:[#allocation6_spill] sm:$0xff]  ;;  %v4525_v41 = vld [vmem:[#allocation23_spill] sm:$0xff]  ;;  %v4543_v45 = vld [vmem:[#allocation8_spill] sm:$0xff] }
 0x1be   : > { %4506 = vst [vmem:[#allocation30_spill] sm:$0xff] %v3406_v3  ;;  %4507 = vst [vmem:[#allocation31_spill] sm:$0xff] %v3408_v43  ;;  %v716_v56 = vmul.f32 %v4516_v10, %v4514_v26  ;;  %v4517_v52 = vsel %vm2996_vm4, %v2764_v15, %v2779_v20  ;;  %v4518_v6 = vsel %vm2996_vm4, %v2767_v16, %v2782_v22  ;;  %2401 = vmatprep.mubr.msk.f32.mxu1 %vm312_vm0, %v4520_v9  ;;  %v4530_v39 = vld [vmem:[#allocation7_spill] sm:$0xff]  ;;  %v4561_v3 = vld [vmem:[#allocation21_spill] sm:$0xff] }
 0x1bf   : > { %4508 = vst [vmem:[#allocation32_spill] sm:$0xff] %v3410_v14  ;;  %4510 = vst [vmem:[#allocation5_spill] sm:$0xff] %v3414_v4  ;;  %v720_v38 = vmul.f32 %v4517_v52, %v4514_v26  ;;  %v724_v5 = vmul.f32 %v4518_v6, %v4514_v26  ;;  %v4519_v8 = vsel %vm2996_vm4, %v2770_v17, %v2785_v23  ;;  %2418 = vmatprep.mubr.msk.f32.mxu0 %vm312_vm0, %v4520_v9  ;;  %v2304_v52 = vld [vmem:[%s4412_s3 + $0x30] sm:$0xff]  ;;  %v4560_v14 = vld [vmem:[#allocation20_spill] sm:$0xff] }
 0x1c0   : > { %4511 = vst [vmem:[#allocation33_spill] sm:$0xff] %v3416_v40  ;;  %4512 = vst [vmem:[#allocation34_spill] sm:$0xff] %v3418_v36  ;;  %v728_v18 = vmul.f32 %v4519_v8, %v4514_v26  ;;  %v4521_v15 = vsel %vm2996_vm4, %v2776_v19, %v2797_v28  ;;  %v4522_v16 = vsel %vm2996_vm4, %v2788_v24, %v2800_v29  ;;  %2402 = vmatmul.mubr.msk.f32.gmra.mxu1 %vm312_vm0, %v4530_v39  ;;  %v4558_v36 = vld [vmem:[#allocation18_spill] sm:$0xff]  ;;  %v4559_v4 = vld [vmem:[#allocation19_spill] sm:$0xff] }
 0x1c1   : > { %4513 = vst [vmem:[#allocation35_spill] sm:$0xff] %v3420_v37  ;;  %v732_v20 = vmul.f32 %v4521_v15, %v4514_v26  ;;  %v736_v22 = vmul.f32 %v4522_v16, %v4514_v26  ;;  %v4523_v17 = vsel %vm2996_vm4, %v2791_v25, %v2804_v33  ;;  %v4524_v19 = vsel %vm2996_vm4, %v2794_v27, %v2807_v34  ;;  %v4557_v37 = vld [vmem:[#allocation17_spill] sm:$0xff] }
 0x1c2   : > { %v740_v23 = vmul.f32 %v4523_v17, %v4514_v26  ;;  %v744_v28 = vmul.f32 %v4524_v19, %v4514_v26  ;;  %v4526_v24 = vsel %vm2996_vm4, %v2826_v44, %v2848_v53  ;;  %v4527_v25 = vsel %vm2996_vm4, %v2829_v46, %v2851_v54  ;;  %2419 = vmatmul.mubr.msk.f32.gmra.mxu0 %vm312_vm0, %v4530_v39 }
 0x1c3   : > { %v1165_v29 = vmul.f32 %v4526_v24, %v4525_v41  ;;  %v1169_v33 = vmul.f32 %v4527_v25, %v4525_v41  ;;  %v4528_v27 = vsel %vm2996_vm4, %v2832_v47, %v2854_v55  ;;  %v4529_v44 = vsel %vm2996_vm4, %v2835_v48, %v2858_v59 }
 0x1c4   : > { %v1173_v34 = vmul.f32 %v4528_v27, %v4525_v41  ;;  %v1177_v53 = vmul.f32 %v4529_v44, %v4525_v41  ;;  %v4531_v46 = vsel %vm2996_vm4, %v2838_v49, %v2861_v60  ;;  %v4532_v47 = vsel %vm2996_vm4, %v2841_v50, %v2864_v61 }
 0x1c5   : > { %v1181_v54 = vmul.f32 %v4531_v46, %v4525_v41  ;;  %v1185_v55 = vmul.f32 %v4532_v47, %v4525_v41  ;;  %v4533_v48 = vsel %vm2996_vm4, %v2844_v51, %v2867_v62  ;;  %v4534_v49 = vsel %vm2996_vm4, %v2874_v0, %v2877_v1  ;;  %v2294_v0 = vld [vmem:[%s4412_s3 + $0x20] sm:$0xff]  ;;  %v2295_v1 = vld [vmem:[%s4412_s3 + $0x28] sm:$0xff] }
 0x1c6   : > { %v1189_v59 = vmul.f32 %v4533_v48, %v4525_v41  ;;  %v1193_v60 = vmul.f32 %v4534_v49, %v4525_v41  ;;  %v3528_v7 = vadd.f32 %v1165_v29, %v716_v56  ;;  %v3530_v50 = vadd.f32 %v1169_v33, %v720_v38  ;;  %v2305_v38 = vld [vmem:[%s4412_s3 + $0x38] sm:$0xff] }
 0x1c7   : > { %v3532_v61 = vadd.f32 %v1173_v34, %v724_v5  ;;  %v3534_v58 = vadd.f32 %v1177_v53, %v728_v18  ;;  %v3536_v51 = vadd.f32 %v1181_v54, %v732_v20  ;;  %v3538_v62 = vadd.f32 %v1185_v55, %v736_v22  ;;  %v4544_v55 = vld [vmem:[#allocation10_spill] sm:$0xff] }
 0x1c8   : > { %4535 = vst [vmem:[#allocation22_spill] sm:$0xff] %v3528_v7  ;;  %4536 = vst [vmem:[#allocation6_spill] sm:$0xff] %v3530_v50  ;;  %v3540_v11 = vadd.f32 %v1189_v59, %v740_v23  ;;  %v3542_v32 = vadd.f32 %v1193_v60, %v744_v28  ;;  %v1401_v21 = vcombine.high %v2294_v0, %v2294_v0  ;;  %v4556_v7 = vld [vmem:[#allocation16_spill] sm:$0xff] }
 0x1c9   : > { %4537 = vst [vmem:[#allocation23_spill] sm:$0xff] %v3532_v61  ;;  %4538 = vst [vmem:[#allocation7_spill] sm:$0xff] %v3534_v58  ;;  %v1451_v42 = vcombine.high %v2295_v1, %v2295_v1  ;;  %v1408_v2 = vrot.slane %v2294_v0, %v4543_v45  ;;  %v1458_v26 = vrot.slane %v2295_v1, %v4543_v45  ;;  %v4554_v58 = vld [vmem:[#allocation14_spill] sm:$0xff]  ;;  %v4555_v61 = vld [vmem:[#allocation15_spill] sm:$0xff] }
 0x1ca   : > { %4539 = vst [vmem:[#allocation36_spill] sm:$0xff] %v3536_v51  ;;  %4540 = vst [vmem:[#allocation37_spill] sm:$0xff] %v3538_v62  ;;  %v1415_v35 = vrot.slane %v1401_v21, %v4543_v45  ;;  %v1850_v9 = vcombine.high %v2304_v52, %v2304_v52  ;;  %v1900_v15 = vcombine.high %v2305_v38, %v2305_v38 }
 0x1cb   : > { %4541 = vst [vmem:[#allocation38_spill] sm:$0xff] %v3540_v11  ;;  %4542 = vst [vmem:[#allocation39_spill] sm:$0xff] %v3542_v32  ;;  %v1465_v10 = vrot.slane %v1451_v42, %v4543_v45  ;;  %v1416_v56 = vcombine.high %v1408_v2, %v1408_v2  ;;  %v1466_v5 = vcombine.high %v1458_v26, %v1458_v26 }
 0x1cc   : > { %v1417_v6 = vcombine.high %v1415_v35, %v1415_v35  ;;  %v1424_v18 = vrot.slane %v1408_v2, %v4543_v45  ;;  %v1431_v20 = vrot.slane %v1415_v35, %v4543_v45  ;;  %v1474_v22 = vrot.slane %v1458_v26, %v4543_v45 }
 0x1cd   : > { %v1467_v8 = vcombine.high %v1465_v10, %v1465_v10  ;;  %v1438_v16 = vrot.slane %v1416_v56, %v4543_v45  ;;  %v1481_v23 = vrot.slane %v1465_v10, %v4543_v45  ;;  %v1488_v19 = vrot.slane %v1466_v5, %v4543_v45 }
 0x1ce   : > { %v1445_v17 = vrot.slane %v1417_v6, %v4543_v45  ;;  %v1857_v28 = vrot.slane %v2304_v52, %v4543_v45  ;;  %v1907_v24 = vrot.slane %v2305_v38, %v4543_v45  ;;  %v1446_v29 = vcombine.high %v1424_v18, %v1424_v18 }
 0x1cf   : > { %v1495_v41 = vrot.slane %v1467_v8, %v4543_v45  ;;  %v1864_v25 = vrot.slane %v1850_v9, %v4543_v45  ;;  %v1914_v33 = vrot.slane %v1900_v15, %v4543_v45  ;;  %v1447_v27 = vcombine.high %v1431_v20, %v1431_v20 }
 0x1d0   : > { %v1448_v34 = vcombine.high %v1438_v16, %v1438_v16  ;;  %v1496_v44 = vcombine.high %v1474_v22, %v1474_v22  ;;  %v1449_v53 = vcombine.high %v1445_v17, %v1445_v17  ;;  %v1497_v39 = vcombine.high %v1481_v23, %v1481_v23 }
 0x1d1   : > { %v1498_v46 = vcombine.high %v1488_v19, %v1488_v19  ;;  %v1865_v54 = vcombine.high %v1857_v28, %v1857_v28  ;;  %v1499_v47 = vcombine.high %v1495_v41, %v1495_v41  ;;  %v3573_v48 = vrot.slane %v1424_v18, %v4544_v55 }
 0x1d2   : > { %v3576_v59 = vrot.slane %v1438_v16, %v4544_v55  ;;  %v1915_v49 = vcombine.high %v1907_v24, %v1907_v24  ;;  %v3579_v60 = vrot.slane %v1446_v29, %v4544_v55  ;;  %v3582_v0 = vrot.slane %v1431_v20, %v4544_v55 }
 0x1d3   : > { %v1866_v1 = vcombine.high %v1864_v25, %v1864_v25  ;;  %v1916_v21 = vcombine.high %v1914_v33, %v1914_v33  ;;  %v3585_v42 = vrot.slane %v1448_v34, %v4544_v55  ;;  %v3588_v2 = vrot.slane %v1445_v17, %v4544_v55 }
 0x1d4   : > { %v3591_v35 = vrot.slane %v1447_v27, %v4544_v55  ;;  %v1873_v26 = vrot.slane %v1857_v28, %v4543_v45  ;;  %v3595_v10 = vrot.slane %v1449_v53, %v4544_v55  ;;  %v3598_v56 = vrot.slane %v1474_v22, %v4544_v55 }
 0x1d5   : > { %v1880_v52 = vrot.slane %v1864_v25, %v4543_v45  ;;  %v1887_v38 = vrot.slane %v1865_v54, %v4543_v45  ;;  %v3603_v6 = vrot.slane %v1488_v19, %v4544_v55  ;;  %v3606_v5 = vrot.slane %v1496_v44, %v4544_v55 }
 0x1d6   : > { %v1923_v8 = vrot.slane %v1907_v24, %v4543_v45  ;;  %v1937_v18 = vrot.slane %v1915_v49, %v4543_v45  ;;  %v3611_v9 = vrot.slane %v1498_v46, %v4544_v55  ;;  %v1894_v15 = vrot.slane %v1866_v1, %v4543_v45 }
 0x1d7   : > { %v1930_v20 = vrot.slane %v1914_v33, %v4543_v45  ;;  %v1944_v16 = vrot.slane %v1916_v21, %v4543_v45  ;;  %v3617_v22 = vrot.slane %v1481_v23, %v4544_v55  ;;  %v3620_v17 = vrot.slane %v1495_v41, %v4544_v55 }
 0x1d8   : > { %v3623_v19 = vrot.slane %v1497_v39, %v4544_v55  ;;  %v1895_v28 = vcombine.high %v1873_v26, %v1873_v26  ;;  %v3626_v24 = vrot.slane %v1499_v47, %v4544_v55  ;;  %v1581_v25 = vsel %vm2746_vm1, %v3573_v48, %v3598_v56 }
 0x1d9   : > { %v1896_v33 = vcombine.high %v1880_v52, %v1880_v52  ;;  %v1897_v45 = vcombine.high %v1887_v38, %v1887_v38  ;;  %v1585_v23 = vsel %vm2746_vm1, %v3576_v59, %v3603_v6  ;;  %v1945_v27 = vcombine.high %v1923_v8, %v1923_v8 }
 0x1da   : > { %v1947_v34 = vcombine.high %v1937_v18, %v1937_v18  ;;  %v1898_v53 = vcombine.high %v1894_v15, %v1894_v15  ;;  %v1946_v39 = vcombine.high %v1930_v20, %v1930_v20  ;;  %v1948_v46 = vcombine.high %v1944_v16, %v1944_v16 }
 0x1db   : > { %v3645_v54 = vrot.slane %v1873_v26, %v4544_v55  ;;  %v3648_v47 = vrot.slane %v1887_v38, %v4544_v55  ;;  %v3651_v49 = vrot.slane %v1895_v28, %v4544_v55  ;;  %v3654_v1 = vrot.slane %v1880_v52, %v4544_v55 }
 0x1dc   : > { %v3657_v21 = vrot.slane %v1897_v45, %v4544_v55  ;;  %v3660_v44 = vrot.slane %v1894_v15, %v4544_v55  ;;  %v3663_v41 = vrot.slane %v1896_v33, %v4544_v55  ;;  %v3666_v26 = vrot.slane %v1923_v8, %v4544_v55 }
 0x1dd   : > { %v3669_v38 = vrot.slane %v1937_v18, %v4544_v55  ;;  %v3672_v28 = vrot.slane %v1945_v27, %v4544_v55  ;;  %v3675_v52 = vrot.slane %v1947_v34, %v4544_v55  ;;  %v3678_v45 = vrot.slane %v1930_v20, %v4544_v55 }
 0x1de   : > { %v3681_v15 = vrot.slane %v1898_v53, %v4544_v55  ;;  %v3684_v33 = vrot.slane %v1944_v16, %v4544_v55  ;;  %v3687_v8 = vrot.slane %v1946_v39, %v4544_v55  ;;  %v3690_v18 = vrot.slane %v1948_v46, %v4544_v55 }
 0x1df   : > { %v4548_v46 = vsel %vm2746_vm1, %v3579_v60, %v3606_v5  ;;  %v4549_v55 = vsel %vm2746_vm1, %v3585_v42, %v3611_v9  ;;  %v4573_v29 = vsel %vm2892_vm2, %v3585_v42, %v3611_v9 }
 0x1e0   : > { %4546 = vst [vmem:[#allocation8_spill] sm:$0xff] %v3684_v33 }
 0x277   : > { %v2400_v16 = vpop.f32.mrf.mxu1 }
 0x278   : > { %v1613_v34 = vmul.f32 %v2400_v16, %v1581_v25  ;;  %v1617_v39 = vmul.f32 %v2400_v16, %v1585_v23  ;;  %v1621_v20 = vmul.f32 %v2400_v16, %v4548_v46  ;;  %v1625_v27 = vmul.f32 %v2400_v16, %v4549_v55  ;;  %v2417_v63 = vpop.f32.mrf.mxu0 }
 0x279   : > { %v4550_v25 = vsel %vm2746_vm1, %v3582_v0, %v3617_v22  ;;  %v4551_v23 = vsel %vm2746_vm1, %v3588_v2, %v3620_v17  ;;  %v4552_v46 = vsel %vm2746_vm1, %v3591_v35, %v3623_v19  ;;  %v4553_v55 = vsel %vm2746_vm1, %v3595_v10, %v3626_v24 }
 0x27a   : > { %v1629_v32 = vmul.f32 %v2400_v16, %v4550_v25  ;;  %v1633_v11 = vmul.f32 %v2400_v16, %v4551_v23  ;;  %v1637_v62 = vmul.f32 %v2400_v16, %v4552_v46  ;;  %v1641_v51 = vmul.f32 %v2400_v16, %v4553_v55 }
 0x27b   : > { %v1645_v25 = vadd.f32 %v1613_v34, %v4554_v58  ;;  %v1649_v50 = vadd.f32 %v1617_v39, %v4555_v61  ;;  %v1653_v30 = vadd.f32 %v1621_v20, %v4556_v7  ;;  %v1657_v23 = vadd.f32 %v1625_v27, %v4557_v37  ;;  %v1377_v39 = vpop.f32.mrf.mxu1 }
 0x27c   : > { %v1661_v40 = vadd.f32 %v1629_v32, %v4558_v36  ;;  %v1665_v46 = vadd.f32 %v1633_v11, %v4559_v4  ;;  %v1669_v43 = vadd.f32 %v1637_v62, %v4560_v14  ;;  %v1673_v57 = vadd.f32 %v1641_v51, %v4561_v3 }
 0x27d   : > { %v4562_v61 = vsel %vm2746_vm1, %v3645_v54, %v3666_v26  ;;  %v4563_v37 = vsel %vm2746_vm1, %v3648_v47, %v3669_v38  ;;  %v4564_v36 = vsel %vm2746_vm1, %v3651_v49, %v3672_v28  ;;  %v4565_v3 = vsel %vm2746_vm1, %v3657_v21, %v3675_v52 }
 0x27e   : > { %v2062_v58 = vmul.f32 %v2417_v63, %v4562_v61  ;;  %v2066_v7 = vmul.f32 %v2417_v63, %v4563_v37  ;;  %v2070_v4 = vmul.f32 %v2417_v63, %v4564_v36  ;;  %v2074_v14 = vmul.f32 %v2417_v63, %v4565_v3 }
 0x27f   : > { %v4566_v51 = vsel %vm2746_vm1, %v3654_v1, %v3678_v45  ;;  %v4567_v11 = vsel %vm2746_vm1, %v3660_v44, %v3684_v33  ;;  %v4568_v27 = vsel %vm2746_vm1, %v3663_v41, %v3687_v8  ;;  %v4569_v16 = vsel %vm2746_vm1, %v3681_v15, %v3690_v18 }
 0x280   : > { %v2078_v62 = vmul.f32 %v2417_v63, %v4566_v51  ;;  %v2082_v32 = vmul.f32 %v2417_v63, %v4567_v11  ;;  %v2086_v20 = vmul.f32 %v2417_v63, %v4568_v27  ;;  %v2090_v34 = vmul.f32 %v2417_v63, %v4569_v16 }
 0x281   : > { %v2094_v55 = vadd.f32 %v2062_v58, %v1645_v25  ;;  %v2098_v61 = vadd.f32 %v2066_v7, %v1649_v50  ;;  %v2102_v37 = vadd.f32 %v2070_v4, %v1653_v30  ;;  %v2106_v36 = vadd.f32 %v2074_v14, %v1657_v23 }
 0x282   : > { %v2110_v3 = vadd.f32 %v2078_v62, %v1661_v40  ;;  %v2114_v51 = vadd.f32 %v2082_v32, %v1665_v46  ;;  %v2118_v11 = vadd.f32 %v2086_v20, %v1669_v43  ;;  %v2122_v33 = vadd.f32 %v2090_v34, %v1673_v57  ;;  %v1826_v32 = vpop.f32.mrf.mxu0  ;;  %v4578_v34 = vld [vmem:[#allocation24_spill] sm:$0xff] }
 0x283   : > { %2127 = vst.msk [vmem:[%s4023_s6 + $0x8] sm:$0xff] %vm2125_vm5, %v2094_v55  ;;  %2131 = vst.msk [vmem:[%s4023_s6 + $0x28] sm:$0xff] %vm2125_vm5, %v2098_v61  ;;  %v4570_v43 = vsel %vm2892_vm2, %v3573_v48, %v3598_v56  ;;  %v4571_v57 = vsel %vm2892_vm2, %v3576_v59, %v3603_v6  ;;  %v4572_v30 = vsel %vm2892_vm2, %v3579_v60, %v3606_v5  ;;  %v4579_v61 = vld [vmem:[#allocation25_spill] sm:$0xff] }
 0x284   : > { %2135 = vst.msk [vmem:[%s4023_s6 + $0x48] sm:$0xff] %vm2125_vm5, %v2102_v37  ;;  %2139 = vst.msk [vmem:[%s4023_s6 + $0x68] sm:$0xff] %vm2125_vm5, %v2106_v36  ;;  %v1612_v63 = vmul.f32 %v4570_v43, %v1377_v39  ;;  %v1616_v40 = vmul.f32 %v4571_v57, %v1377_v39  ;;  %v1620_v50 = vmul.f32 %v4572_v30, %v1377_v39  ;;  %v4580_v36 = vld [vmem:[#allocation26_spill] sm:$0xff]  ;;  %v4582_v43 = vld [vmem:[#allocation28_spill] sm:$0xff] }
 0x285   : > { %v1624_v25 = vmul.f32 %v4573_v29, %v1377_v39  ;;  %2143 = vst.msk [vmem:[%s4023_s6 + $0x88] sm:$0xff] %vm2125_vm5, %v2110_v3  ;;  %2147 = vst.msk [vmem:[%s4023_s6 + $0xa8] sm:$0xff] %vm2125_vm5, %v2114_v51  ;;  %v4574_v23 = vsel %vm2892_vm2, %v3582_v0, %v3617_v22  ;;  %v4575_v58 = vsel %vm2892_vm2, %v3588_v2, %v3620_v17  ;;  %v4581_v51 = vld [vmem:[#allocation27_spill] sm:$0xff] }
 0x286   : > { %2151 = vst.msk [vmem:[%s4023_s6 + $0xc8] sm:$0xff] %vm2125_vm5, %v2118_v11  ;;  %2155 = vst.msk [vmem:[%s4023_s6 + $0xe8] sm:$0xff] %vm2125_vm5, %v2122_v33  ;;  %v1628_v46 = vmul.f32 %v4574_v23, %v1377_v39  ;;  %v1632_v7 = vmul.f32 %v4575_v58, %v1377_v39  ;;  %v4576_v4 = vsel %vm2892_vm2, %v3591_v35, %v3623_v19  ;;  %v4588_v23 = vld [vmem:[#allocation8_spill] sm:$0xff] }
 0x287   : > { %v1636_v14 = vmul.f32 %v4576_v4, %v1377_v39  ;;  %v4577_v33 = vsel %vm2892_vm2, %v3595_v10, %v3626_v24  ;;  %v1644_v27 = vadd.f32 %v1612_v63, %v3308_v31  ;;  %v1648_v20 = vadd.f32 %v1616_v40, %v3310_v12 }
 0x288   : > { %v1640_v62 = vmul.f32 %v4577_v33, %v1377_v39  ;;  %v1652_v16 = vadd.f32 %v1620_v50, %v3312_v13  ;;  %v1656_v55 = vadd.f32 %v1624_v25, %v4578_v34  ;;  %v1660_v37 = vadd.f32 %v1628_v46, %v4579_v61 }
 0x289   : > { %v1664_v3 = vadd.f32 %v1632_v7, %v4580_v36  ;;  %v1668_v11 = vadd.f32 %v1636_v14, %v4581_v51  ;;  %v4583_v39 = vsel %vm2892_vm2, %v3645_v54, %v3666_v26  ;;  %v4584_v12 = vsel %vm2892_vm2, %v3648_v47, %v3669_v38 }
 0x28a   : > { %v1672_v57 = vadd.f32 %v1640_v62, %v4582_v43  ;;  %v2061_v31 = vmul.f32 %v4583_v39, %v1826_v32  ;;  %v2065_v13 = vmul.f32 %v4584_v12, %v1826_v32  ;;  %v4585_v63 = vsel %vm2892_vm2, %v3651_v49, %v3672_v28  ;;  %v2403_v62 = vpop.f32.mrf.mxu1 }
 0x28b   : > { %v2069_v40 = vmul.f32 %v4585_v63, %v1826_v32  ;;  %v4586_v30 = vsel %vm2892_vm2, %v3657_v21, %v3675_v52  ;;  %v4587_v29 = vsel %vm2892_vm2, %v3654_v1, %v3678_v45  ;;  %v4589_v46 = vsel %vm2892_vm2, %v3660_v44, %v4588_v23 }
 0x28c   : > { %v2073_v50 = vmul.f32 %v4586_v30, %v1826_v32  ;;  %v2077_v25 = vmul.f32 %v4587_v29, %v1826_v32  ;;  %v2081_v58 = vmul.f32 %v4589_v46, %v1826_v32  ;;  %v4590_v7 = vsel %vm2892_vm2, %v3663_v41, %v3687_v8  ;;  %v4601_v46 = vld [vmem:[#allocation29_spill] sm:$0xff] }
 0x28d   : > { %v2085_v4 = vmul.f32 %v4590_v7, %v1826_v32  ;;  %v4591_v14 = vsel %vm2892_vm2, %v3681_v15, %v3690_v18  ;;  %v2093_v34 = vadd.f32 %v2061_v31, %v1644_v27  ;;  %v2097_v61 = vadd.f32 %v2065_v13, %v1648_v20  ;;  %v4602_v7 = vld [vmem:[#allocation30_spill] sm:$0xff] }
 0x28e   : > { %v2089_v33 = vmul.f32 %v4591_v14, %v1826_v32  ;;  %v2101_v36 = vadd.f32 %v2069_v40, %v1652_v16  ;;  %v2105_v51 = vadd.f32 %v2073_v50, %v1656_v55  ;;  %v2109_v43 = vadd.f32 %v2077_v25, %v1660_v37  ;;  %v4603_v14 = vld [vmem:[#allocation31_spill] sm:$0xff] }
 0x28f   : > { %v2113_v39 = vadd.f32 %v2081_v58, %v1664_v3  ;;  %v2117_v12 = vadd.f32 %v2085_v4, %v1668_v11  ;;  %2126 = vst.msk [vmem:[%s4023_s6] sm:$0xff] %vm2125_vm5, %v2093_v34  ;;  %2130 = vst.msk [vmem:[%s4023_s6 + $0x20] sm:$0xff] %vm2125_vm5, %v2097_v61  ;;  %v4593_v32 = vsel %vm2964_vm3, %v3573_v48, %v3598_v56  ;;  %v4604_v34 = vld [vmem:[#allocation32_spill] sm:$0xff] }
 0x290   : > { %v2121_v63 = vadd.f32 %v2089_v33, %v1672_v57  ;;  %2134 = vst.msk [vmem:[%s4023_s6 + $0x40] sm:$0xff] %vm2125_vm5, %v2101_v36  ;;  %2138 = vst.msk [vmem:[%s4023_s6 + $0x60] sm:$0xff] %vm2125_vm5, %v2105_v51  ;;  %v1615_v27 = vmul.f32 %v2403_v62, %v4593_v32  ;;  %v4594_v20 = vsel %vm2964_vm3, %v3576_v59, %v3603_v6  ;;  %v4605_v36 = vld [vmem:[#allocation5_spill] sm:$0xff]  ;;  %v4608_v32 = vld [vmem:[#allocation35_spill] sm:$0xff] }
 0x291   : > { %v1619_v16 = vmul.f32 %v2403_v62, %v4594_v20  ;;  %v4595_v55 = vsel %vm2964_vm3, %v3579_v60, %v3606_v5  ;;  %v4596_v3 = vsel %vm2964_vm3, %v3585_v42, %v3611_v9  ;;  %2142 = vst.msk [vmem:[%s4023_s6 + $0x80] sm:$0xff] %vm2125_vm5, %v2109_v43  ;;  %2146 = vst.msk [vmem:[%s4023_s6 + $0xa0] sm:$0xff] %vm2125_vm5, %v2113_v39  ;;  %v4606_v43 = vld [vmem:[#allocation33_spill] sm:$0xff] }
 0x292   : > { %v1623_v37 = vmul.f32 %v2403_v62, %v4595_v55  ;;  %v1627_v11 = vmul.f32 %v2403_v62, %v4596_v3  ;;  %2150 = vst.msk [vmem:[%s4023_s6 + $0xc0] sm:$0xff] %vm2125_vm5, %v2117_v12  ;;  %2154 = vst.msk [vmem:[%s4023_s6 + $0xe0] sm:$0xff] %vm2125_vm5, %v2121_v63  ;;  %v4597_v57 = vsel %vm2964_vm3, %v3582_v0, %v3617_v22  ;;  %v4607_v12 = vld [vmem:[#allocation34_spill] sm:$0xff]  ;;  %v2420_v55 = vpop.f32.mrf.mxu0 }
 0x293   : > { %v1631_v31 = vmul.f32 %v2403_v62, %v4597_v57  ;;  %v4598_v13 = vsel %vm2964_vm3, %v3588_v2, %v3620_v17  ;;  %v4599_v30 = vsel %vm2964_vm3, %v3591_v35, %v3623_v19  ;;  %v4600_v29 = vsel %vm2964_vm3, %v3595_v10, %v3626_v24 }
 0x294   : > { %v1635_v40 = vmul.f32 %v2403_v62, %v4598_v13  ;;  %v1639_v50 = vmul.f32 %v2403_v62, %v4599_v30  ;;  %v1643_v25 = vmul.f32 %v2403_v62, %v4600_v29  ;;  %v1647_v58 = vadd.f32 %v1615_v27, %v4601_v46 }
 0x295   : > { %v1651_v4 = vadd.f32 %v1619_v16, %v4602_v7  ;;  %v1655_v33 = vadd.f32 %v1623_v37, %v4603_v14  ;;  %v1659_v61 = vadd.f32 %v1627_v11, %v4604_v34  ;;  %v1663_v51 = vadd.f32 %v1631_v31, %v4605_v36  ;;  %v1387_v14 = vpop.f32.mrf.mxu1 }
 0x296   : > { %v1667_v39 = vadd.f32 %v1635_v40, %v4606_v43  ;;  %v1671_v63 = vadd.f32 %v1639_v50, %v4607_v12  ;;  %v1675_v20 = vadd.f32 %v1643_v25, %v4608_v32  ;;  %v4609_v62 = vsel %vm2964_vm3, %v3645_v54, %v3666_v26 }
 0x297   : > { %v2064_v27 = vmul.f32 %v2420_v55, %v4609_v62  ;;  %v4610_v16 = vsel %vm2964_vm3, %v3648_v47, %v3669_v38  ;;  %v4611_v3 = vsel %vm2964_vm3, %v3651_v49, %v3672_v28  ;;  %v4612_v57 = vsel %vm2964_vm3, %v3657_v21, %v3675_v52 }
 0x298   : > { %v2068_v37 = vmul.f32 %v2420_v55, %v4610_v16  ;;  %v2072_v11 = vmul.f32 %v2420_v55, %v4611_v3  ;;  %v2076_v31 = vmul.f32 %v2420_v55, %v4612_v57  ;;  %v4613_v13 = vsel %vm2964_vm3, %v3654_v1, %v3678_v45 }
 0x299   : > { %v2080_v40 = vmul.f32 %v2420_v55, %v4613_v13  ;;  %v4614_v30 = vsel %vm2964_vm3, %v3660_v44, %v4588_v23  ;;  %v4615_v29 = vsel %vm2964_vm3, %v3663_v41, %v3687_v8  ;;  %v4616_v46 = vsel %vm2964_vm3, %v3681_v15, %v3690_v18 }
 0x29a   : > { %v2084_v50 = vmul.f32 %v2420_v55, %v4614_v30  ;;  %v2088_v25 = vmul.f32 %v2420_v55, %v4615_v29  ;;  %v2092_v7 = vmul.f32 %v2420_v55, %v4616_v46  ;;  %v2096_v34 = vadd.f32 %v2064_v27, %v1647_v58  ;;  %v4627_v27 = vld [vmem:[#allocation6_spill] sm:$0xff] }
 0x29b   : > { %v2100_v36 = vadd.f32 %v2068_v37, %v1651_v4  ;;  %v2104_v43 = vadd.f32 %v2072_v11, %v1655_v33  ;;  %v2108_v12 = vadd.f32 %v2076_v31, %v1659_v61  ;;  %v2112_v32 = vadd.f32 %v2080_v40, %v1663_v51  ;;  %v4628_v11 = vld [vmem:[#allocation23_spill] sm:$0xff]  ;;  %v4630_v31 = vld [vmem:[#allocation36_spill] sm:$0xff]  ;;  %v4631_v40 = vld [vmem:[#allocation37_spill] sm:$0xff] }
 0x29c   : > { %v2116_v62 = vadd.f32 %v2084_v50, %v1667_v39  ;;  %v2120_v16 = vadd.f32 %v2088_v25, %v1671_v63  ;;  %v2124_v3 = vadd.f32 %v2092_v7, %v1675_v20  ;;  %2129 = vst.msk [vmem:[%s4023_s6 + $0x18] sm:$0xff] %vm2125_vm5, %v2096_v34  ;;  %v4618_v58 = vsel %vm2996_vm4, %v3573_v48, %v3598_v56  ;;  %v4633_v50 = vld [vmem:[#allocation39_spill] sm:$0xff] }
 0x29d   : > { %2133 = vst.msk [vmem:[%s4023_s6 + $0x38] sm:$0xff] %vm2125_vm5, %v2100_v36  ;;  %2137 = vst.msk [vmem:[%s4023_s6 + $0x58] sm:$0xff] %vm2125_vm5, %v2104_v43  ;;  %v1614_v4 = vmul.f32 %v4618_v58, %v1387_v14  ;;  %v4619_v33 = vsel %vm2996_vm4, %v3576_v59, %v3603_v6  ;;  %v4620_v51 = vsel %vm2996_vm4, %v3579_v60, %v3606_v5 }
 0x29e   : > { %2141 = vst.msk [vmem:[%s4023_s6 + $0x78] sm:$0xff] %vm2125_vm5, %v2108_v12  ;;  %v1618_v61 = vmul.f32 %v4619_v33, %v1387_v14  ;;  %v1622_v39 = vmul.f32 %v4620_v51, %v1387_v14  ;;  %v4621_v63 = vsel %vm2996_vm4, %v3585_v42, %v3611_v9  ;;  %2145 = vst.msk [vmem:[%s4023_s6 + $0x98] sm:$0xff] %vm2125_vm5, %v2112_v32 }
 0x29f   : > { %v1626_v20 = vmul.f32 %v4621_v63, %v1387_v14  ;;  %2149 = vst.msk [vmem:[%s4023_s6 + $0xb8] sm:$0xff] %vm2125_vm5, %v2116_v62  ;;  %2153 = vst.msk [vmem:[%s4023_s6 + $0xd8] sm:$0xff] %vm2125_vm5, %v2120_v16  ;;  %v4622_v48 = vsel %vm2996_vm4, %v3582_v0, %v3617_v22  ;;  %v4623_v60 = vsel %vm2996_vm4, %v3588_v2, %v3620_v17  ;;  %v1836_v0 = vpop.f32.mrf.mxu0  ;;  %v4626_v22 = vld [vmem:[#allocation22_spill] sm:$0xff]  ;;  %v4629_v17 = vld [vmem:[#allocation7_spill] sm:$0xff] }
 0x2a0   : > { %2157 = vst.msk [vmem:[%s4023_s6 + $0xf8] sm:$0xff] %vm2125_vm5, %v2124_v3  ;;  %v1630_v59 = vmul.f32 %v4622_v48, %v1387_v14  ;;  %v1634_v42 = vmul.f32 %v4623_v60, %v1387_v14  ;;  %v4624_v56 = vsel %vm2996_vm4, %v3591_v35, %v3623_v19  ;;  %v4625_v5 = vsel %vm2996_vm4, %v3595_v10, %v3626_v24  ;;  %v4632_v19 = vld [vmem:[#allocation38_spill] sm:$0xff] }
 0x2a1   : > { %v1638_v6 = vmul.f32 %v4624_v56, %v1387_v14  ;;  %v1642_v9 = vmul.f32 %v4625_v5, %v1387_v14  ;;  %v1646_v55 = vadd.f32 %v1614_v4, %v4626_v22  ;;  %v1650_v37 = vadd.f32 %v1618_v61, %v4627_v27 }
 0x2a2   : > { %v1654_v2 = vadd.f32 %v1622_v39, %v4628_v11  ;;  %v1658_v57 = vadd.f32 %v1626_v20, %v4629_v17  ;;  %v1662_v13 = vadd.f32 %v1630_v59, %v4630_v31  ;;  %v1666_v35 = vadd.f32 %v1634_v42, %v4631_v40 }
 0x2a3   : > { %v1670_v30 = vadd.f32 %v1638_v6, %v4632_v19  ;;  %v1674_v29 = vadd.f32 %v1642_v9, %v4633_v50  ;;  %v4634_v10 = vsel %vm2996_vm4, %v3645_v54, %v3666_v26  ;;  %v4635_v25 = vsel %vm2996_vm4, %v3648_v47, %v3669_v38 }
 0x2a4   : > { %v2063_v24 = vmul.f32 %v4634_v10, %v1836_v0  ;;  %v2067_v46 = vmul.f32 %v4635_v25, %v1836_v0  ;;  %v4636_v7 = vsel %vm2996_vm4, %v3651_v49, %v3672_v28  ;;  %v4637_v34 = vsel %vm2996_vm4, %v3657_v21, %v3675_v52 }
 0x2a5   : > { %v2071_v14 = vmul.f32 %v4636_v7, %v1836_v0  ;;  %v2075_v54 = vmul.f32 %v4637_v34, %v1836_v0  ;;  %v4638_v26 = vsel %vm2996_vm4, %v3654_v1, %v3678_v45  ;;  %v4639_v49 = vsel %vm2996_vm4, %v3660_v44, %v4588_v23 }
 0x2a6   : > { %v2079_v47 = vmul.f32 %v4638_v26, %v1836_v0  ;;  %v2083_v38 = vmul.f32 %v4639_v49, %v1836_v0  ;;  %v4640_v21 = vsel %vm2996_vm4, %v3663_v41, %v3687_v8  ;;  %v4641_v1 = vsel %vm2996_vm4, %v3681_v15, %v3690_v18 }
 0x2a7   : > { %v2087_v28 = vmul.f32 %v4640_v21, %v1836_v0  ;;  %v2091_v52 = vmul.f32 %v4641_v1, %v1836_v0  ;;  %v2095_v45 = vadd.f32 %v2063_v24, %v1646_v55  ;;  %v2099_v44 = vadd.f32 %v2067_v46, %v1650_v37 }
 0x2a8   : > { %v2103_v23 = vadd.f32 %v2071_v14, %v1654_v2  ;;  %v2107_v36 = vadd.f32 %v2075_v54, %v1658_v57  ;;  %v2111_v41 = vadd.f32 %v2079_v47, %v1662_v13  ;;  %v2115_v15 = vadd.f32 %v2083_v38, %v1666_v35 }
 0x2a9   : > { %v2119_v8 = vadd.f32 %v2087_v28, %v1670_v30  ;;  %v2123_v18 = vadd.f32 %v2091_v52, %v1674_v29  ;;  %2128 = vst.msk [vmem:[%s4023_s6 + $0x10] sm:$0xff] %vm2125_vm5, %v2095_v45  ;;  %2132 = vst.msk [vmem:[%s4023_s6 + $0x30] sm:$0xff] %vm2125_vm5, %v2099_v44 }
 0x2aa   : > { %2136 = vst.msk [vmem:[%s4023_s6 + $0x50] sm:$0xff] %vm2125_vm5, %v2103_v23  ;;  %2140 = vst.msk [vmem:[%s4023_s6 + $0x70] sm:$0xff] %vm2125_vm5, %v2107_v36 }
 0x2ab   : > { %2144 = vst.msk [vmem:[%s4023_s6 + $0x90] sm:$0xff] %vm2125_vm5, %v2111_v41  ;;  %2148 = vst.msk [vmem:[%s4023_s6 + $0xb0] sm:$0xff] %vm2125_vm5, %v2115_v15 }
 0x2ac   : > { %2152 = vst.msk [vmem:[%s4023_s6 + $0xd0] sm:$0xff] %vm2125_vm5, %v2119_v8  ;;  %2156 = vst.msk [vmem:[%s4023_s6 + $0xf0] sm:$0xff] %vm2125_vm5, %v2123_v18 }
 0x2ad   : > { %2500 = shalt.err (!%p2497_p5)
}
 0x2ae   : > { %s2501_s22 = scalar_lea.hbm %s4342_s10, 4096  ;;  %s2505_s29 = scalar_lea.hbm %s4413_s4, 8192 }
 0x2af   : > { %p2502_p6 = scmp.ne.s32.totalorder %s4342_s10, %s2501_s22  ;;  %p2506_p10 = scmp.lt.s32.totalorder %s4342_s10, %s4413_s4 }
 0x2b0   : > { %p2507_p11 = scmp.lt.s32.totalorder %s2505_s29, %s2501_s22 }
 0x2b1   : > { %p2503_p7 = pnand %p2502_p6, %p2634_p4 }
 0x2b2   : > { %p2508_p12 = por %p2507_p11, %p2506_p10 }
 0x2b3   : > { %p2504_p9 = pneg %p2503_p7 }
 0x2b5   : > { %p2509_p13 = pnand %p2508_p12, %p2504_p9 }
 0x2b7   : > { %2512 = shalt.err (!%p2509_p13)
}
 0x2b8   : > { %s2567_s6 = smov 128   ;;  %s2568_s7 = smov 8  }
 0x2b9   : > { %2421 = dma.vmem_to_hbm [thread:$0]  (%p2634_p4), %s4344_s8, 4096, %s4342_s10, %s4364_s11, %s2567_s6, %s2567_s6, %s2568_s7  }
 0x2ba PF: > { %p2427_p0 = scmp.ge.s32.totalorder %s2563_s20, 2  ;;  %s2190_s18 = sand.u32 1, %s2543_s15  }
 0x2bb   : > { %s2191_s9 = scalar_lea.sflag [#allocation3], %s2190_s18 }
 0x2bc   : > { %p2424_p1 = pnand %p2427_p0, %p2641_p8 }
 0x2be   : > { %p2425_p2 = pneg %p2424_p1 }
 0x2c0   : > { %2538 = dma.done.wait (%p2425_p2), %s2191_s9, 4096  }
 0x2c1   : > { %2540 = vsyncadd (%p2425_p2), %s2191_s9, 4294963200  ;;  %s17_s20 = sadd.s32 1, %s2563_s20   ;;  %s4642_s15 = smov %s2547_s16 }
 0x2c2   : > { %p14_p3 = scmp.ge.s32.totalorder %s17_s20, 4   ;;  %s4643_s16 = smov %s2551_s17 }
 0x2c3   : > { %s4644_s17 = smov %s2647_s28  ;;  %s4645_s18 = smov %s2559_s19 }
 0x2c4   : > { %s4646_s19 = smov %s4648_s23  ;;  %16 = sbr.rel (!%p14_p3) target bundleno = 4 (0x4), region = 81 }
 0x2c9   :  { %2196 = vsyncpa [#allocation3], 1 }
 0x2ca   :  { %2198 = vsyncpa [#allocation3 + $0x1], 1 }

</bundles_post_ra>
